<compile_context>
chip_gen: v6e
topology: v6e:2x2x1
jax: 0.10.0
libtpu: 0.0.40
codegen_flags: <defaults>
</compile_context>

<pallas_src>
import functools

import numpy as np
import jax
import jax.numpy as jnp
from jax import lax
from jax.experimental import pallas as pl
from jax.experimental.pallas import tpu as pltpu

_ROWS = 8        # sublane rows per packed-parameter slot
_COLS = 16       # lane cols per packed-parameter slot (>= 9 taps, toy channels)
_HIGHEST = jax.lax.Precision.HIGHEST


# ------------------------------ kernel helpers --------------------------------

def _affine_act(y, sc, bi, act):
    """Folded-BN affine + optional activation.  y:[C,S]  sc,bi:[C,1]."""
    y = y * sc + bi
    if act == 'relu':
        return jnp.maximum(y, 0.0)
    if act == 'hard_swish':
        return y * (jnp.clip(y + 3.0, 0.0, 6.0) * (1.0 / 6.0))
    return y


def _dw3x3(phases, w_c9, stride, oh, ow):
    """Depthwise 3x3 conv, padding=1, stride in {1,2} (pre-BN).

    phases[a][b] : [C, S] slab with phases[a][b][c, i*ow+j] = x[c, stride*i+a,
                   stride*j+b]  (for stride==1 there is a single phase).
    w_c9         : [C, 9] per-channel taps, tap index kh*3+kw.
    Each tap = static lane slice of a once-padded value + boundary mask + FMA,
    so there is no VMEM staging buffer and no strided gather.
    """
    C = w_c9.shape[0]
    S = oh * ow
    pad = ow + 1                                     # max |flattened shift|
    sidx = lax.broadcasted_iota(jnp.int32, (1, S), 1)
    if ow & (ow - 1) == 0:
        jj = jnp.bitwise_and(sidx, ow - 1)           # column index (power of 2)
    else:
        jj = sidx % ow
    zero = jnp.zeros((C, pad), jnp.float32)
    padded = [[jnp.concatenate([zero, p, zero], axis=1) for p in row]
              for row in phases]

    acc = jnp.zeros((C, S), jnp.float32)
    for kh in range(3):
        dh = kh - 1
        a = dh % stride
        si = (dh - a) // stride                      # row shift in output grid
        for kw in range(3):
            dwc = kw - 1
            b = dwc % stride
            sj = (dwc - b) // stride                 # col shift in output grid
            d = si * ow + sj                         # flattened shift
            tap = padded[a][b][:, pad + d: pad + d + S]
            masks = []
            if si < 0:
                masks.append(sidx >= ow)
            elif si > 0:
                masks.append(sidx < (oh - 1) * ow)
            if sj < 0:
                masks.append(jj >= 1)
            elif sj > 0:
                masks.append(jj <= ow - 2)
            if masks:
                m = masks[0]
                for extra in masks[1:]:
                    m = jnp.logical_and(m, extra)
                tap = jnp.where(m, tap, 0.0)
            acc = acc + tap * w_c9[:, kh * 3 + kw: kh * 3 + kw + 1]
    return acc


# ------------------------------- fused kernel ----------------------------------

def _ird_kernel(x_ref, p_ref, o_ref, *, stride, oh, ow, cin, mid2, cr, half,
                out_ch, act):
    f32 = jnp.float32

    def mat(idx, r, c):
        return p_ref[idx, :r, :c].astype(f32)

    def col(idx, r):
        return p_ref[idx, :r, :1].astype(f32)

    def dot(w, x):
        return jnp.dot(w, x, preferred_element_type=f32, precision=_HIGHEST)

    # Input phases: block is [1, stride*stride, cin, S]; loads are [cin, S].
    ph = [[x_ref[0, a * stride + b].astype(f32) for b in range(stride)]
          for a in range(stride)]

    # ---- branch 1: dw3x3(stride)+BN -> 1x1+BN+act -----------------------------
    x1 = _dw3x3(ph, mat(0, cin, 9), stride, oh, ow)
    x1 = _affine_act(x1, col(1, cin), col(2, cin), None)
    x1 = _affine_act(dot(mat(3, half, cin), x1), col(4, half), col(5, half), act)

    # ---- branch 2: 1x1+BN+act -> dw3x3(stride)+BN -> SE -> 1x1+BN+act ---------
    # The 1x1 conv is pointwise, so it is applied per input phase (the phases
    # partition the full-resolution pixels exactly once).
    pw2_w, pw2_s, pw2_b = mat(6, mid2, cin), col(7, mid2), col(8, mid2)
    ph2 = [[_affine_act(dot(pw2_w, p), pw2_s, pw2_b, act) for p in row]
           for row in ph]
    x2 = _dw3x3(ph2, mat(9, mid2, 9), stride, oh, ow)
    x2 = _affine_act(x2, col(10, mid2), col(11, mid2), None)
    # Squeeze-Excite: lane reduction + two tiny FCs on the MXU.
    pooled = jnp.mean(x2, axis=1, keepdims=True)                       # [mid2,1]
    hid = jnp.maximum(dot(mat(12, cr, mid2), pooled) + col(13, cr), 0.0)
    gate = dot(mat(14, mid2, cr), hid) + col(15, mid2)
    gate = jnp.clip(gate + 3.0, 0.0, 6.0) * (1.0 / 6.0)                # hardsigmoid
    x2 = x2 * gate
    x2 = _affine_act(dot(mat(16, half, mid2), x2), col(17, half), col(18, half),
                     act)

    # ---- MV1 tail; torch.cat([x1, x2], 1) is fused away -----------------------
    y1 = _affine_act(_dw3x3([[x1]], mat(19, half, 9), 1, oh, ow),
                     col(20, half), col(21, half), 'hard_swish')
    y2 = _affine_act(_dw3x3([[x2]], mat(22, half, 9), 1, oh, ow),
                     col(23, half), col(24, half), 'hard_swish')
    y = dot(mat(25, out_ch, half), y1) + dot(mat(26, out_ch, half), y2)
    y = _affine_act(y, col(27, out_ch), col(28, out_ch), 'hard_swish')

    o_ref[0] = y.astype(o_ref.dtype)


# --------------------------------- wrapper --------------------------------------

def inverted_residual_ds_forward(x_nchw, p, stride, act='relu'):
    n, cin, h, w = x_nchw.shape
    assert stride in (1, 2)
    assert h % stride == 0 and w % stride == 0
    oh, ow = h // stride, w // stride
    S = oh * ow
    mid2 = p['pw2_w'].shape[1]
    out_ch = p['dwmv1_w'].shape[-1]
    half = out_ch // 2
    cr = p['se_w1'].shape[1]

    # ---- pack all params into one [n_items, 8, 16] f32 slab (one DMA) ---------
    def dwT(wt):                                    # (3,3,C) -> (C,9), k = kh*3+kw
        return jnp.transpose(wt, (2, 0, 1)).reshape(wt.shape[-1], 9)

    items = [
        dwT(p['dw1_w']), p['dw1_scale'], p['dw1_bias'],
        p['lin1_w'].T, p['lin1_scale'], p['lin1_bias'],
        p['pw2_w'].T, p['pw2_scale'], p['pw2_bias'],
        dwT(p['dw2_w']), p['dw2_scale'], p['dw2_bias'],
        p['se_w1'].T, p['se_b1'], p['se_w2'].T, p['se_b2'],
        p['lin2_w'].T, p['lin2_scale'], p['lin2_bias'],
        dwT(p['dwmv1_w'][:, :, :half]), p['dwmv1_scale'][:half], p['dwmv1_bias'][:half],
        dwT(p['dwmv1_w'][:, :, half:]), p['dwmv1_scale'][half:], p['dwmv1_bias'][half:],
        p['pwmv1_w'][:half, :].T, p['pwmv1_w'][half:, :].T,
        p['pwmv1_scale'], p['pwmv1_bias'],
    ]

    def pad_item(a):
        a = jnp.asarray(a, jnp.float32)
        if a.ndim == 1:
            a = a[:, None]
        assert a.shape[0] <= _ROWS and a.shape[1] <= _COLS, a.shape
        return jnp.pad(a, ((0, _ROWS - a.shape[0]), (0, _COLS - a.shape[1])))

    slab = jnp.stack([pad_item(a) for a in items])            # [29, 8, 16]

    # ---- polyphase split of the input (spatial flattened onto lanes) ----------
    xph = x_nchw.reshape(n, cin, oh, stride, ow, stride)
    xph = jnp.transpose(xph, (0, 3, 5, 1, 2, 4)).reshape(n, stride * stride, cin, S)
    xph = xph.astype(jnp.float32)

    kern = functools.partial(
        _ird_kernel, stride=stride, oh=oh, ow=ow, cin=cin, mid2=mid2, cr=cr,
        half=half, out_ch=out_ch, act=act)

    out = pl.pallas_call(
        kern,
        out_shape=jax.ShapeDtypeStruct((n, out_ch, S), x_nchw.dtype),
        grid=(n,),
        in_specs=[
            pl.BlockSpec((1, stride * stride, cin, S), lambda i: (i, 0, 0, 0)),
            pl.BlockSpec(slab.shape, lambda i: (0, 0, 0)),
        ],
        out_specs=pl.BlockSpec((1, out_ch, S), lambda i: (i, 0, 0)),
        compiler_params=pltpu.CompilerParams(
            dimension_semantics=("parallel",)),
    )(xph, slab)

    return out.reshape(n, out_ch, oh, ow)                     # NCHW


# ------------------------------ reference (JAX) ---------------------------------

def _forward_ref(x_nchw, p, stride, act='relu'):
    prec = _HIGHEST
    x = jnp.transpose(x_nchw, (0, 2, 3, 1))

    def bn_act(y, scale, bias, a):
        y = y * scale + bias
        if a == 'relu':
            y = jnp.maximum(y, 0.0)
        elif a == 'hard_swish':
            y = y * (jnp.clip(y + 3.0, 0.0, 6.0) * (1.0 / 6.0))
        return y

    def dw(xx, wt, scale, bias, s, a):
        y = jax.lax.conv_general_dilated(
            xx, wt[:, :, None, :], (s, s), [(1, 1), (1, 1)],
            dimension_numbers=('NHWC', 'HWIO', 'NHWC'),
            feature_group_count=xx.shape[-1], precision=prec)
        return bn_act(y, scale, bias, a)

    def pw(xx, wt, scale, bias, a):
        y = jax.lax.conv_general_dilated(
            xx, wt[None, None, :, :], (1, 1), [(0, 0), (0, 0)],
            dimension_numbers=('NHWC', 'HWIO', 'NHWC'), precision=prec)
        return bn_act(y, scale, bias, a)

    def se(xx, w1, b1, w2, b2):
        pooled = jnp.mean(xx, axis=(1, 2))
        hh = jnp.maximum(jnp.dot(pooled, w1, precision=prec) + b1, 0.0)
        s = jnp.clip(jnp.dot(hh, w2, precision=prec) + b2 + 3.0, 0.0, 6.0) * (1.0 / 6.0)
        return xx * s[:, None, None, :]

    x1 = dw(x, p['dw1_w'], p['dw1_scale'], p['dw1_bias'], stride, None)
    x1 = pw(x1, p['lin1_w'], p['lin1_scale'], p['lin1_bias'], act)
    x2 = pw(x, p['pw2_w'], p['pw2_scale'], p['pw2_bias'], act)
    x2 = dw(x2, p['dw2_w'], p['dw2_scale'], p['dw2_bias'], stride, None)
    x2 = se(x2, p['se_w1'], p['se_b1'], p['se_w2'], p['se_b2'])
    x2 = pw(x2, p['lin2_w'], p['lin2_scale'], p['lin2_bias'], act)
    out = jnp.concatenate([x1, x2], axis=-1)
    out = dw(out, p['dwmv1_w'], p['dwmv1_scale'], p['dwmv1_bias'], 1, 'hard_swish')
    out = pw(out, p['pwmv1_w'], p['pwmv1_scale'], p['pwmv1_bias'], 'hard_swish')
    return jnp.transpose(out, (0, 3, 1, 2))


# ------------------------------ parameter init ----------------------------------

def _make_bn(key, c, eps=1e-5):
    k1, k2, k3, k4 = jax.random.split(key, 4)
    gamma = 1.0 + 0.1 * jax.random.normal(k1, (c,), jnp.float32)
    beta = 0.1 * jax.random.normal(k2, (c,), jnp.float32)
    mean = 0.1 * jax.random.normal(k3, (c,), jnp.float32)
    var = 1.0 + 0.1 * jax.random.uniform(k4, (c,), jnp.float32)
    scale = gamma / jnp.sqrt(var + eps)
    bias = beta - mean * scale
    return scale, bias


def init_params(key, in_ch, mid_ch, out_ch):
    keys = iter(jax.random.split(key, 32))
    nk = lambda: next(keys)
    p = {}
    p['dw1_w'] = 0.3 * jax.random.normal(nk(), (3, 3, in_ch), jnp.float32)
    p['dw1_scale'], p['dw1_bias'] = _make_bn(nk(), in_ch)
    p['lin1_w'] = 0.3 * jax.random.normal(nk(), (in_ch, out_ch // 2), jnp.float32)
    p['lin1_scale'], p['lin1_bias'] = _make_bn(nk(), out_ch // 2)
    p['pw2_w'] = 0.3 * jax.random.normal(nk(), (in_ch, mid_ch // 2), jnp.float32)
    p['pw2_scale'], p['pw2_bias'] = _make_bn(nk(), mid_ch // 2)
    p['dw2_w'] = 0.3 * jax.random.normal(nk(), (3, 3, mid_ch // 2), jnp.float32)
    p['dw2_scale'], p['dw2_bias'] = _make_bn(nk(), mid_ch // 2)
    c, cr = mid_ch // 2, (mid_ch // 2) // 4
    p['se_w1'] = 0.3 * jax.random.normal(nk(), (c, cr), jnp.float32)
    p['se_b1'] = 0.1 * jax.random.normal(nk(), (cr,), jnp.float32)
    p['se_w2'] = 0.3 * jax.random.normal(nk(), (cr, c), jnp.float32)
    p['se_b2'] = 0.1 * jax.random.normal(nk(), (c,), jnp.float32)
    p['lin2_w'] = 0.3 * jax.random.normal(nk(), (mid_ch // 2, out_ch // 2), jnp.float32)
    p['lin2_scale'], p['lin2_bias'] = _make_bn(nk(), out_ch // 2)
    p['dwmv1_w'] = 0.3 * jax.random.normal(nk(), (3, 3, out_ch), jnp.float32)
    p['dwmv1_scale'], p['dwmv1_bias'] = _make_bn(nk(), out_ch)
    p['pwmv1_w'] = 0.3 * jax.random.normal(nk(), (out_ch, out_ch), jnp.float32)
    p['pwmv1_scale'], p['pwmv1_bias'] = _make_bn(nk(), out_ch)
    return p


# ------------------------------------ main ---------------------------------------

if __name__ == "__main__":
    key = jax.random.PRNGKey(0)
    k_x, k_p = jax.random.split(key)

    in_ch, mid_ch, out_ch, stride = 4, 8, 8, 2
    x = jax.random.normal(k_x, (2, in_ch, 16, 16), jnp.float32)   # NCHW, like PyTorch
    params = init_params(k_p, in_ch, mid_ch, out_ch)

    out = jax.block_until_ready(
        inverted_residual_ds_forward(x, params, stride, act='relu'))
    ref = jax.block_until_ready(_forward_ref(x, params, stride, act='relu'))

    assert out.shape == (2, out_ch, 8, 8), out.shape
    np.testing.assert_allclose(np.asarray(out), np.asarray(ref), rtol=1e-4, atol=1e-4)
    print("KERNEL_OK")
</pallas_src>

<mosaic_0001>
module attributes {stable_mosaic.version = 11 : i64} {
  func.func @_ird_kernel(%arg0: i32, %arg1: memref<1x4x4x64xf32, #tpu.memory_space<vmem>>, %arg2: memref<29x8x16xf32, #tpu.memory_space<vmem>>, %arg3: memref<1x8x64xf32, #tpu.memory_space<vmem>>) attributes {dimension_semantics = [#tpu.dimension_semantics<parallel>], iteration_bounds = array<i64: 2>, scalar_prefetch = 0 : i64, scratch_operands = 0 : i64, tpu.core_type = #tpu.core_type<tc>, window_params = [{transform_indices = @transform_0, window_bounds = array<i64: 1, 4, 4, 64>}, {pipeline_mode = #tpu.pipeline_mode<synchronous>, transform_indices = @transform_1, window_bounds = array<i64: 29, 8, 16>}, {transform_indices = @transform_2, window_bounds = array<i64: 1, 8, 64>}]} {
    %c0 = arith.constant 0 : index
    %c0_0 = arith.constant 0 : index
    %c0_1 = arith.constant 0 : index
    %c0_2 = arith.constant 0 : index
    %0 = vector.load %arg1[%c0, %c0_0, %c0_1, %c0_2] : memref<1x4x4x64xf32, #tpu.memory_space<vmem>>, vector<1x1x4x64xf32>
    %1 = vector.shape_cast %0 : vector<1x1x4x64xf32> to vector<4x64xf32>
    %c0_3 = arith.constant 0 : index
    %c1 = arith.constant 1 : index
    %c0_4 = arith.constant 0 : index
    %c0_5 = arith.constant 0 : index
    %2 = vector.load %arg1[%c0_3, %c1, %c0_4, %c0_5] : memref<1x4x4x64xf32, #tpu.memory_space<vmem>>, vector<1x1x4x64xf32>
    %3 = vector.shape_cast %2 : vector<1x1x4x64xf32> to vector<4x64xf32>
    %c0_6 = arith.constant 0 : index
    %c2 = arith.constant 2 : index
    %c0_7 = arith.constant 0 : index
    %c0_8 = arith.constant 0 : index
    %4 = vector.load %arg1[%c0_6, %c2, %c0_7, %c0_8] : memref<1x4x4x64xf32, #tpu.memory_space<vmem>>, vector<1x1x4x64xf32>
    %5 = vector.shape_cast %4 : vector<1x1x4x64xf32> to vector<4x64xf32>
    %c0_9 = arith.constant 0 : index
    %c3 = arith.constant 3 : index
    %c0_10 = arith.constant 0 : index
    %c0_11 = arith.constant 0 : index
    %6 = vector.load %arg1[%c0_9, %c3, %c0_10, %c0_11] : memref<1x4x4x64xf32, #tpu.memory_space<vmem>>, vector<1x1x4x64xf32>
    %7 = vector.shape_cast %6 : vector<1x1x4x64xf32> to vector<4x64xf32>
    %c0_12 = arith.constant 0 : index
    %c0_13 = arith.constant 0 : index
    %c0_14 = arith.constant 0 : index
    %8 = vector.load %arg2[%c0_12, %c0_13, %c0_14] : memref<29x8x16xf32, #tpu.memory_space<vmem>>, vector<1x4x9xf32>
    %9 = vector.shape_cast %8 : vector<1x4x9xf32> to vector<4x9xf32>
    %10 = tpu.iota {dimensions = array<i32: 1>} : vector<1x64xi32>
    %c7_i32 = arith.constant 7 : i32
    %11 = vector.broadcast %c7_i32 : i32 to vector<1x64xi32>
    %12 = arith.andi %10, %11 : vector<1x64xi32>
    %cst = arith.constant 0.000000e+00 : f32
    %13 = vector.broadcast %cst : f32 to vector<4x9xf32>
    %14 = tpu.concatenate %13, %1, %13 in 1 : vector<4x9xf32>, vector<4x64xf32>, vector<4x9xf32> -> vector<4x82xf32>
    %15 = tpu.concatenate %13, %3, %13 in 1 : vector<4x9xf32>, vector<4x64xf32>, vector<4x9xf32> -> vector<4x82xf32>
    %16 = tpu.concatenate %13, %5, %13 in 1 : vector<4x9xf32>, vector<4x64xf32>, vector<4x9xf32> -> vector<4x82xf32>
    %17 = tpu.concatenate %13, %7, %13 in 1 : vector<4x9xf32>, vector<4x64xf32>, vector<4x9xf32> -> vector<4x82xf32>
    %cst_15 = arith.constant 0.000000e+00 : f32
    %18 = vector.broadcast %cst_15 : f32 to vector<4x64xf32>
    %19 = vector.extract_strided_slice %17 {offsets = [0, 0], sizes = [4, 64], strides = [1, 1]} : vector<4x82xf32> to vector<4x64xf32>
    %c8_i32 = arith.constant 8 : i32
    %20 = vector.broadcast %c8_i32 : i32 to vector<1x64xi32>
    %21 = arith.cmpi sge, %10, %20 : vector<1x64xi32>
    %c1_i32 = arith.constant 1 : i32
    %22 = vector.broadcast %c1_i32 : i32 to vector<1x64xi32>
    %23 = arith.cmpi sge, %12, %22 : vector<1x64xi32>
    %24 = arith.andi %21, %23 : vector<1x64xi1>
    %cst_16 = arith.constant 0.000000e+00 : f32
    %25 = vector.shape_cast %24 : vector<1x64xi1> to vector<1x64xi1>
    %26 = vector.broadcast %25 : vector<1x64xi1> to vector<4x64xi1>
    %27 = vector.broadcast %cst_16 : f32 to vector<4x64xf32>
    %28 = arith.select %26, %19, %27 : vector<4x64xi1>, vector<4x64xf32>
    %29 = vector.extract_strided_slice %9 {offsets = [0, 0], sizes = [4, 1], strides = [1, 1]} : vector<4x9xf32> to vector<4x1xf32>
    %30 = vector.broadcast %29 : vector<4x1xf32> to vector<4x64xf32>
    %31 = arith.mulf %28, %30 : vector<4x64xf32>
    %32 = arith.addf %18, %31 : vector<4x64xf32>
    %33 = vector.extract_strided_slice %16 {offsets = [0, 1], sizes = [4, 64], strides = [1, 1]} : vector<4x82xf32> to vector<4x64xf32>
    %c8_i32_17 = arith.constant 8 : i32
    %34 = vector.broadcast %c8_i32_17 : i32 to vector<1x64xi32>
    %35 = arith.cmpi sge, %10, %34 : vector<1x64xi32>
    %cst_18 = arith.constant 0.000000e+00 : f32
    %36 = vector.shape_cast %35 : vector<1x64xi1> to vector<1x64xi1>
    %37 = vector.broadcast %36 : vector<1x64xi1> to vector<4x64xi1>
    %38 = vector.broadcast %cst_18 : f32 to vector<4x64xf32>
    %39 = arith.select %37, %33, %38 : vector<4x64xi1>, vector<4x64xf32>
    %40 = vector.extract_strided_slice %9 {offsets = [0, 1], sizes = [4, 1], strides = [1, 1]} : vector<4x9xf32> to vector<4x1xf32>
    %41 = vector.broadcast %40 : vector<4x1xf32> to vector<4x64xf32>
    %42 = arith.mulf %39, %41 : vector<4x64xf32>
    %43 = arith.addf %32, %42 : vector<4x64xf32>
    %44 = vector.extract_strided_slice %17 {offsets = [0, 1], sizes = [4, 64], strides = [1, 1]} : vector<4x82xf32> to vector<4x64xf32>
    %c8_i32_19 = arith.constant 8 : i32
    %45 = vector.broadcast %c8_i32_19 : i32 to vector<1x64xi32>
    %46 = arith.cmpi sge, %10, %45 : vector<1x64xi32>
    %cst_20 = arith.constant 0.000000e+00 : f32
    %47 = vector.shape_cast %46 : vector<1x64xi1> to vector<1x64xi1>
    %48 = vector.broadcast %47 : vector<1x64xi1> to vector<4x64xi1>
    %49 = vector.broadcast %cst_20 : f32 to vector<4x64xf32>
    %50 = arith.select %48, %44, %49 : vector<4x64xi1>, vector<4x64xf32>
    %51 = vector.extract_strided_slice %9 {offsets = [0, 2], sizes = [4, 1], strides = [1, 1]} : vector<4x9xf32> to vector<4x1xf32>
    %52 = vector.broadcast %51 : vector<4x1xf32> to vector<4x64xf32>
    %53 = arith.mulf %50, %52 : vector<4x64xf32>
    %54 = arith.addf %43, %53 : vector<4x64xf32>
    %55 = vector.extract_strided_slice %15 {offsets = [0, 8], sizes = [4, 64], strides = [1, 1]} : vector<4x82xf32> to vector<4x64xf32>
    %c1_i32_21 = arith.constant 1 : i32
    %56 = vector.broadcast %c1_i32_21 : i32 to vector<1x64xi32>
    %57 = arith.cmpi sge, %12, %56 : vector<1x64xi32>
    %cst_22 = arith.constant 0.000000e+00 : f32
    %58 = vector.shape_cast %57 : vector<1x64xi1> to vector<1x64xi1>
    %59 = vector.broadcast %58 : vector<1x64xi1> to vector<4x64xi1>
    %60 = vector.broadcast %cst_22 : f32 to vector<4x64xf32>
    %61 = arith.select %59, %55, %60 : vector<4x64xi1>, vector<4x64xf32>
    %62 = vector.extract_strided_slice %9 {offsets = [0, 3], sizes = [4, 1], strides = [1, 1]} : vector<4x9xf32> to vector<4x1xf32>
    %63 = vector.broadcast %62 : vector<4x1xf32> to vector<4x64xf32>
    %64 = arith.mulf %61, %63 : vector<4x64xf32>
    %65 = arith.addf %54, %64 : vector<4x64xf32>
    %66 = vector.extract_strided_slice %14 {offsets = [0, 9], sizes = [4, 64], strides = [1, 1]} : vector<4x82xf32> to vector<4x64xf32>
    %67 = vector.extract_strided_slice %9 {offsets = [0, 4], sizes = [4, 1], strides = [1, 1]} : vector<4x9xf32> to vector<4x1xf32>
    %68 = vector.broadcast %67 : vector<4x1xf32> to vector<4x64xf32>
    %69 = arith.mulf %66, %68 : vector<4x64xf32>
    %70 = arith.addf %65, %69 : vector<4x64xf32>
    %71 = vector.extract_strided_slice %15 {offsets = [0, 9], sizes = [4, 64], strides = [1, 1]} : vector<4x82xf32> to vector<4x64xf32>
    %72 = vector.extract_strided_slice %9 {offsets = [0, 5], sizes = [4, 1], strides = [1, 1]} : vector<4x9xf32> to vector<4x1xf32>
    %73 = vector.broadcast %72 : vector<4x1xf32> to vector<4x64xf32>
    %74 = arith.mulf %71, %73 : vector<4x64xf32>
    %75 = arith.addf %70, %74 : vector<4x64xf32>
    %76 = vector.extract_strided_slice %17 {offsets = [0, 8], sizes = [4, 64], strides = [1, 1]} : vector<4x82xf32> to vector<4x64xf32>
    %c1_i32_23 = arith.constant 1 : i32
    %77 = vector.broadcast %c1_i32_23 : i32 to vector<1x64xi32>
    %78 = arith.cmpi sge, %12, %77 : vector<1x64xi32>
    %cst_24 = arith.constant 0.000000e+00 : f32
    %79 = vector.shape_cast %78 : vector<1x64xi1> to vector<1x64xi1>
    %80 = vector.broadcast %79 : vector<1x64xi1> to vector<4x64xi1>
    %81 = vector.broadcast %cst_24 : f32 to vector<4x64xf32>
    %82 = arith.select %80, %76, %81 : vector<4x64xi1>, vector<4x64xf32>
    %83 = vector.extract_strided_slice %9 {offsets = [0, 6], sizes = [4, 1], strides = [1, 1]} : vector<4x9xf32> to vector<4x1xf32>
    %84 = vector.broadcast %83 : vector<4x1xf32> to vector<4x64xf32>
    %85 = arith.mulf %82, %84 : vector<4x64xf32>
    %86 = arith.addf %75, %85 : vector<4x64xf32>
    %87 = vector.extract_strided_slice %16 {offsets = [0, 9], sizes = [4, 64], strides = [1, 1]} : vector<4x82xf32> to vector<4x64xf32>
    %88 = vector.extract_strided_slice %9 {offsets = [0, 7], sizes = [4, 1], strides = [1, 1]} : vector<4x9xf32> to vector<4x1xf32>
    %89 = vector.broadcast %88 : vector<4x1xf32> to vector<4x64xf32>
    %90 = arith.mulf %87, %89 : vector<4x64xf32>
    %91 = arith.addf %86, %90 : vector<4x64xf32>
    %92 = vector.extract_strided_slice %17 {offsets = [0, 9], sizes = [4, 64], strides = [1, 1]} : vector<4x82xf32> to vector<4x64xf32>
    %93 = vector.extract_strided_slice %9 {offsets = [0, 8], sizes = [4, 1], strides = [1, 1]} : vector<4x9xf32> to vector<4x1xf32>
    %94 = vector.broadcast %93 : vector<4x1xf32> to vector<4x64xf32>
    %95 = arith.mulf %92, %94 : vector<4x64xf32>
    %96 = arith.addf %91, %95 : vector<4x64xf32>
    %c1_25 = arith.constant 1 : index
    %c0_26 = arith.constant 0 : index
    %c0_27 = arith.constant 0 : index
    %97 = vector.load %arg2[%c1_25, %c0_26, %c0_27] : memref<29x8x16xf32, #tpu.memory_space<vmem>>, vector<1x4x1xf32>
    %98 = vector.shape_cast %97 : vector<1x4x1xf32> to vector<4x1xf32>
    %c2_28 = arith.constant 2 : index
    %c0_29 = arith.constant 0 : index
    %c0_30 = arith.constant 0 : index
    %99 = vector.load %arg2[%c2_28, %c0_29, %c0_30] : memref<29x8x16xf32, #tpu.memory_space<vmem>>, vector<1x4x1xf32>
    %100 = vector.shape_cast %99 : vector<1x4x1xf32> to vector<4x1xf32>
    %101 = vector.broadcast %98 : vector<4x1xf32> to vector<4x64xf32>
    %102 = arith.mulf %96, %101 : vector<4x64xf32>
    %103 = vector.broadcast %100 : vector<4x1xf32> to vector<4x64xf32>
    %104 = arith.addf %102, %103 : vector<4x64xf32>
    %c3_31 = arith.constant 3 : index
    %c0_32 = arith.constant 0 : index
    %c0_33 = arith.constant 0 : index
    %105 = vector.load %arg2[%c3_31, %c0_32, %c0_33] : memref<29x8x16xf32, #tpu.memory_space<vmem>>, vector<1x4x4xf32>
    %106 = vector.shape_cast %105 : vector<1x4x4xf32> to vector<4x4xf32>
    %cst_34 = arith.constant dense<0.000000e+00> : vector<4x64xf32>
    %107 = tpu.matmul %106, %104, %cst_34 {dimension_numbers = #tpu.dot_dimension_numbers<[1], [0], [0], [1], [0, 0, 1, 1], [], []>, precision = #tpu.contract_precision<fp32>} : vector<4x4xf32>, vector<4x64xf32>, vector<4x64xf32> -> vector<4x64xf32>
    %c4 = arith.constant 4 : index
    %c0_35 = arith.constant 0 : index
    %c0_36 = arith.constant 0 : index
    %108 = vector.load %arg2[%c4, %c0_35, %c0_36] : memref<29x8x16xf32, #tpu.memory_space<vmem>>, vector<1x4x1xf32>
    %109 = vector.shape_cast %108 : vector<1x4x1xf32> to vector<4x1xf32>
    %c5 = arith.constant 5 : index
    %c0_37 = arith.constant 0 : index
    %c0_38 = arith.constant 0 : index
    %110 = vector.load %arg2[%c5, %c0_37, %c0_38] : memref<29x8x16xf32, #tpu.memory_space<vmem>>, vector<1x4x1xf32>
    %111 = vector.shape_cast %110 : vector<1x4x1xf32> to vector<4x1xf32>
    %112 = vector.broadcast %109 : vector<4x1xf32> to vector<4x64xf32>
    %113 = arith.mulf %107, %112 : vector<4x64xf32>
    %114 = vector.broadcast %111 : vector<4x1xf32> to vector<4x64xf32>
    %115 = arith.addf %113, %114 : vector<4x64xf32>
    %cst_39 = arith.constant 0.000000e+00 : f32
    %116 = vector.broadcast %cst_39 : f32 to vector<4x64xf32>
    %117 = arith.maximumf %115, %116 : vector<4x64xf32>
    %c6 = arith.constant 6 : index
    %c0_40 = arith.constant 0 : index
    %c0_41 = arith.constant 0 : index
    %118 = vector.load %arg2[%c6, %c0_40, %c0_41] : memref<29x8x16xf32, #tpu.memory_space<vmem>>, vector<1x4x4xf32>
    %119 = vector.shape_cast %118 : vector<1x4x4xf32> to vector<4x4xf32>
    %c7 = arith.constant 7 : index
    %c0_42 = arith.constant 0 : index
    %c0_43 = arith.constant 0 : index
    %120 = vector.load %arg2[%c7, %c0_42, %c0_43] : memref<29x8x16xf32, #tpu.memory_space<vmem>>, vector<1x4x1xf32>
    %121 = vector.shape_cast %120 : vector<1x4x1xf32> to vector<4x1xf32>
    %c8 = arith.constant 8 : index
    %c0_44 = arith.constant 0 : index
    %c0_45 = arith.constant 0 : index
    %122 = vector.load %arg2[%c8, %c0_44, %c0_45] : memref<29x8x16xf32, #tpu.memory_space<vmem>>, vector<1x4x1xf32>
    %123 = vector.shape_cast %122 : vector<1x4x1xf32> to vector<4x1xf32>
    %cst_46 = arith.constant dense<0.000000e+00> : vector<4x64xf32>
    %124 = tpu.matmul %119, %1, %cst_46 {dimension_numbers = #tpu.dot_dimension_numbers<[1], [0], [0], [1], [0, 0, 1, 1], [], []>, precision = #tpu.contract_precision<fp32>} : vector<4x4xf32>, vector<4x64xf32>, vector<4x64xf32> -> vector<4x64xf32>
    %125 = vector.broadcast %121 : vector<4x1xf32> to vector<4x64xf32>
    %126 = arith.mulf %124, %125 : vector<4x64xf32>
    %127 = vector.broadcast %123 : vector<4x1xf32> to vector<4x64xf32>
    %128 = arith.addf %126, %127 : vector<4x64xf32>
    %cst_47 = arith.constant 0.000000e+00 : f32
    %129 = vector.broadcast %cst_47 : f32 to vector<4x64xf32>
    %130 = arith.maximumf %128, %129 : vector<4x64xf32>
    %cst_48 = arith.constant dense<0.000000e+00> : vector<4x64xf32>
    %131 = tpu.matmul %119, %3, %cst_48 {dimension_numbers = #tpu.dot_dimension_numbers<[1], [0], [0], [1], [0, 0, 1, 1], [], []>, precision = #tpu.contract_precision<fp32>} : vector<4x4xf32>, vector<4x64xf32>, vector<4x64xf32> -> vector<4x64xf32>
    %132 = vector.broadcast %121 : vector<4x1xf32> to vector<4x64xf32>
    %133 = arith.mulf %131, %132 : vector<4x64xf32>
    %134 = vector.broadcast %123 : vector<4x1xf32> to vector<4x64xf32>
    %135 = arith.addf %133, %134 : vector<4x64xf32>
    %cst_49 = arith.constant 0.000000e+00 : f32
    %136 = vector.broadcast %cst_49 : f32 to vector<4x64xf32>
    %137 = arith.maximumf %135, %136 : vector<4x64xf32>
    %cst_50 = arith.constant dense<0.000000e+00> : vector<4x64xf32>
    %138 = tpu.matmul %119, %5, %cst_50 {dimension_numbers = #tpu.dot_dimension_numbers<[1], [0], [0], [1], [0, 0, 1, 1], [], []>, precision = #tpu.contract_precision<fp32>} : vector<4x4xf32>, vector<4x64xf32>, vector<4x64xf32> -> vector<4x64xf32>
    %139 = vector.broadcast %121 : vector<4x1xf32> to vector<4x64xf32>
    %140 = arith.mulf %138, %139 : vector<4x64xf32>
    %141 = vector.broadcast %123 : vector<4x1xf32> to vector<4x64xf32>
    %142 = arith.addf %140, %141 : vector<4x64xf32>
    %cst_51 = arith.constant 0.000000e+00 : f32
    %143 = vector.broadcast %cst_51 : f32 to vector<4x64xf32>
    %144 = arith.maximumf %142, %143 : vector<4x64xf32>
    %cst_52 = arith.constant dense<0.000000e+00> : vector<4x64xf32>
    %145 = tpu.matmul %119, %7, %cst_52 {dimension_numbers = #tpu.dot_dimension_numbers<[1], [0], [0], [1], [0, 0, 1, 1], [], []>, precision = #tpu.contract_precision<fp32>} : vector<4x4xf32>, vector<4x64xf32>, vector<4x64xf32> -> vector<4x64xf32>
    %146 = vector.broadcast %121 : vector<4x1xf32> to vector<4x64xf32>
    %147 = arith.mulf %145, %146 : vector<4x64xf32>
    %148 = vector.broadcast %123 : vector<4x1xf32> to vector<4x64xf32>
    %149 = arith.addf %147, %148 : vector<4x64xf32>
    %cst_53 = arith.constant 0.000000e+00 : f32
    %150 = vector.broadcast %cst_53 : f32 to vector<4x64xf32>
    %151 = arith.maximumf %149, %150 : vector<4x64xf32>
    %c9 = arith.constant 9 : index
    %c0_54 = arith.constant 0 : index
    %c0_55 = arith.constant 0 : index
    %152 = vector.load %arg2[%c9, %c0_54, %c0_55] : memref<29x8x16xf32, #tpu.memory_space<vmem>>, vector<1x4x9xf32>
    %153 = vector.shape_cast %152 : vector<1x4x9xf32> to vector<4x9xf32>
    %154 = tpu.iota {dimensions = array<i32: 1>} : vector<1x64xi32>
    %c7_i32_56 = arith.constant 7 : i32
    %155 = vector.broadcast %c7_i32_56 : i32 to vector<1x64xi32>
    %156 = arith.andi %154, %155 : vector<1x64xi32>
    %cst_57 = arith.constant 0.000000e+00 : f32
    %157 = vector.broadcast %cst_57 : f32 to vector<4x9xf32>
    %158 = tpu.concatenate %157, %130, %157 in 1 : vector<4x9xf32>, vector<4x64xf32>, vector<4x9xf32> -> vector<4x82xf32>
    %159 = tpu.concatenate %157, %137, %157 in 1 : vector<4x9xf32>, vector<4x64xf32>, vector<4x9xf32> -> vector<4x82xf32>
    %160 = tpu.concatenate %157, %144, %157 in 1 : vector<4x9xf32>, vector<4x64xf32>, vector<4x9xf32> -> vector<4x82xf32>
    %161 = tpu.concatenate %157, %151, %157 in 1 : vector<4x9xf32>, vector<4x64xf32>, vector<4x9xf32> -> vector<4x82xf32>
    %cst_58 = arith.constant 0.000000e+00 : f32
    %162 = vector.broadcast %cst_58 : f32 to vector<4x64xf32>
    %163 = vector.extract_strided_slice %161 {offsets = [0, 0], sizes = [4, 64], strides = [1, 1]} : vector<4x82xf32> to vector<4x64xf32>
    %c8_i32_59 = arith.constant 8 : i32
    %164 = vector.broadcast %c8_i32_59 : i32 to vector<1x64xi32>
    %165 = arith.cmpi sge, %154, %164 : vector<1x64xi32>
    %c1_i32_60 = arith.constant 1 : i32
    %166 = vector.broadcast %c1_i32_60 : i32 to vector<1x64xi32>
    %167 = arith.cmpi sge, %156, %166 : vector<1x64xi32>
    %168 = arith.andi %165, %167 : vector<1x64xi1>
    %cst_61 = arith.constant 0.000000e+00 : f32
    %169 = vector.shape_cast %168 : vector<1x64xi1> to vector<1x64xi1>
    %170 = vector.broadcast %169 : vector<1x64xi1> to vector<4x64xi1>
    %171 = vector.broadcast %cst_61 : f32 to vector<4x64xf32>
    %172 = arith.select %170, %163, %171 : vector<4x64xi1>, vector<4x64xf32>
    %173 = vector.extract_strided_slice %153 {offsets = [0, 0], sizes = [4, 1], strides = [1, 1]} : vector<4x9xf32> to vector<4x1xf32>
    %174 = vector.broadcast %173 : vector<4x1xf32> to vector<4x64xf32>
    %175 = arith.mulf %172, %174 : vector<4x64xf32>
    %176 = arith.addf %162, %175 : vector<4x64xf32>
    %177 = vector.extract_strided_slice %160 {offsets = [0, 1], sizes = [4, 64], strides = [1, 1]} : vector<4x82xf32> to vector<4x64xf32>
    %c8_i32_62 = arith.constant 8 : i32
    %178 = vector.broadcast %c8_i32_62 : i32 to vector<1x64xi32>
    %179 = arith.cmpi sge, %154, %178 : vector<1x64xi32>
    %cst_63 = arith.constant 0.000000e+00 : f32
    %180 = vector.shape_cast %179 : vector<1x64xi1> to vector<1x64xi1>
    %181 = vector.broadcast %180 : vector<1x64xi1> to vector<4x64xi1>
    %182 = vector.broadcast %cst_63 : f32 to vector<4x64xf32>
    %183 = arith.select %181, %177, %182 : vector<4x64xi1>, vector<4x64xf32>
    %184 = vector.extract_strided_slice %153 {offsets = [0, 1], sizes = [4, 1], strides = [1, 1]} : vector<4x9xf32> to vector<4x1xf32>
    %185 = vector.broadcast %184 : vector<4x1xf32> to vector<4x64xf32>
    %186 = arith.mulf %183, %185 : vector<4x64xf32>
    %187 = arith.addf %176, %186 : vector<4x64xf32>
    %188 = vector.extract_strided_slice %161 {offsets = [0, 1], sizes = [4, 64], strides = [1, 1]} : vector<4x82xf32> to vector<4x64xf32>
    %c8_i32_64 = arith.constant 8 : i32
    %189 = vector.broadcast %c8_i32_64 : i32 to vector<1x64xi32>
    %190 = arith.cmpi sge, %154, %189 : vector<1x64xi32>
    %cst_65 = arith.constant 0.000000e+00 : f32
    %191 = vector.shape_cast %190 : vector<1x64xi1> to vector<1x64xi1>
    %192 = vector.broadcast %191 : vector<1x64xi1> to vector<4x64xi1>
    %193 = vector.broadcast %cst_65 : f32 to vector<4x64xf32>
    %194 = arith.select %192, %188, %193 : vector<4x64xi1>, vector<4x64xf32>
    %195 = vector.extract_strided_slice %153 {offsets = [0, 2], sizes = [4, 1], strides = [1, 1]} : vector<4x9xf32> to vector<4x1xf32>
    %196 = vector.broadcast %195 : vector<4x1xf32> to vector<4x64xf32>
    %197 = arith.mulf %194, %196 : vector<4x64xf32>
    %198 = arith.addf %187, %197 : vector<4x64xf32>
    %199 = vector.extract_strided_slice %159 {offsets = [0, 8], sizes = [4, 64], strides = [1, 1]} : vector<4x82xf32> to vector<4x64xf32>
    %c1_i32_66 = arith.constant 1 : i32
    %200 = vector.broadcast %c1_i32_66 : i32 to vector<1x64xi32>
    %201 = arith.cmpi sge, %156, %200 : vector<1x64xi32>
    %cst_67 = arith.constant 0.000000e+00 : f32
    %202 = vector.shape_cast %201 : vector<1x64xi1> to vector<1x64xi1>
    %203 = vector.broadcast %202 : vector<1x64xi1> to vector<4x64xi1>
    %204 = vector.broadcast %cst_67 : f32 to vector<4x64xf32>
    %205 = arith.select %203, %199, %204 : vector<4x64xi1>, vector<4x64xf32>
    %206 = vector.extract_strided_slice %153 {offsets = [0, 3], sizes = [4, 1], strides = [1, 1]} : vector<4x9xf32> to vector<4x1xf32>
    %207 = vector.broadcast %206 : vector<4x1xf32> to vector<4x64xf32>
    %208 = arith.mulf %205, %207 : vector<4x64xf32>
    %209 = arith.addf %198, %208 : vector<4x64xf32>
    %210 = vector.extract_strided_slice %158 {offsets = [0, 9], sizes = [4, 64], strides = [1, 1]} : vector<4x82xf32> to vector<4x64xf32>
    %211 = vector.extract_strided_slice %153 {offsets = [0, 4], sizes = [4, 1], strides = [1, 1]} : vector<4x9xf32> to vector<4x1xf32>
    %212 = vector.broadcast %211 : vector<4x1xf32> to vector<4x64xf32>
    %213 = arith.mulf %210, %212 : vector<4x64xf32>
    %214 = arith.addf %209, %213 : vector<4x64xf32>
    %215 = vector.extract_strided_slice %159 {offsets = [0, 9], sizes = [4, 64], strides = [1, 1]} : vector<4x82xf32> to vector<4x64xf32>
    %216 = vector.extract_strided_slice %153 {offsets = [0, 5], sizes = [4, 1], strides = [1, 1]} : vector<4x9xf32> to vector<4x1xf32>
    %217 = vector.broadcast %216 : vector<4x1xf32> to vector<4x64xf32>
    %218 = arith.mulf %215, %217 : vector<4x64xf32>
    %219 = arith.addf %214, %218 : vector<4x64xf32>
    %220 = vector.extract_strided_slice %161 {offsets = [0, 8], sizes = [4, 64], strides = [1, 1]} : vector<4x82xf32> to vector<4x64xf32>
    %c1_i32_68 = arith.constant 1 : i32
    %221 = vector.broadcast %c1_i32_68 : i32 to vector<1x64xi32>
    %222 = arith.cmpi sge, %156, %221 : vector<1x64xi32>
    %cst_69 = arith.constant 0.000000e+00 : f32
    %223 = vector.shape_cast %222 : vector<1x64xi1> to vector<1x64xi1>
    %224 = vector.broadcast %223 : vector<1x64xi1> to vector<4x64xi1>
    %225 = vector.broadcast %cst_69 : f32 to vector<4x64xf32>
    %226 = arith.select %224, %220, %225 : vector<4x64xi1>, vector<4x64xf32>
    %227 = vector.extract_strided_slice %153 {offsets = [0, 6], sizes = [4, 1], strides = [1, 1]} : vector<4x9xf32> to vector<4x1xf32>
    %228 = vector.broadcast %227 : vector<4x1xf32> to vector<4x64xf32>
    %229 = arith.mulf %226, %228 : vector<4x64xf32>
    %230 = arith.addf %219, %229 : vector<4x64xf32>
    %231 = vector.extract_strided_slice %160 {offsets = [0, 9], sizes = [4, 64], strides = [1, 1]} : vector<4x82xf32> to vector<4x64xf32>
    %232 = vector.extract_strided_slice %153 {offsets = [0, 7], sizes = [4, 1], strides = [1, 1]} : vector<4x9xf32> to vector<4x1xf32>
    %233 = vector.broadcast %232 : vector<4x1xf32> to vector<4x64xf32>
    %234 = arith.mulf %231, %233 : vector<4x64xf32>
    %235 = arith.addf %230, %234 : vector<4x64xf32>
    %236 = vector.extract_strided_slice %161 {offsets = [0, 9], sizes = [4, 64], strides = [1, 1]} : vector<4x82xf32> to vector<4x64xf32>
    %237 = vector.extract_strided_slice %153 {offsets = [0, 8], sizes = [4, 1], strides = [1, 1]} : vector<4x9xf32> to vector<4x1xf32>
    %238 = vector.broadcast %237 : vector<4x1xf32> to vector<4x64xf32>
    %239 = arith.mulf %236, %238 : vector<4x64xf32>
    %240 = arith.addf %235, %239 : vector<4x64xf32>
    %c10 = arith.constant 10 : index
    %c0_70 = arith.constant 0 : index
    %c0_71 = arith.constant 0 : index
    %241 = vector.load %arg2[%c10, %c0_70, %c0_71] : memref<29x8x16xf32, #tpu.memory_space<vmem>>, vector<1x4x1xf32>
    %242 = vector.shape_cast %241 : vector<1x4x1xf32> to vector<4x1xf32>
    %c11 = arith.constant 11 : index
    %c0_72 = arith.constant 0 : index
    %c0_73 = arith.constant 0 : index
    %243 = vector.load %arg2[%c11, %c0_72, %c0_73] : memref<29x8x16xf32, #tpu.memory_space<vmem>>, vector<1x4x1xf32>
    %244 = vector.shape_cast %243 : vector<1x4x1xf32> to vector<4x1xf32>
    %245 = vector.broadcast %242 : vector<4x1xf32> to vector<4x64xf32>
    %246 = arith.mulf %240, %245 : vector<4x64xf32>
    %247 = vector.broadcast %244 : vector<4x1xf32> to vector<4x64xf32>
    %248 = arith.addf %246, %247 : vector<4x64xf32>
    %cst_74 = arith.constant dense<0.000000e+00> : vector<4xf32>
    %249 = vector.multi_reduction <add>, %248, %cst_74 [1] : vector<4x64xf32> to vector<4xf32>
    %250 = vector.shape_cast %249 : vector<4xf32> to vector<4x1xf32>
    %cst_75 = arith.constant 6.400000e+01 : f32
    %251 = vector.broadcast %cst_75 : f32 to vector<4x1xf32>
    %252 = arith.divf %250, %251 : vector<4x1xf32>
    %c12 = arith.constant 12 : index
    %c0_76 = arith.constant 0 : index
    %c0_77 = arith.constant 0 : index
    %253 = vector.load %arg2[%c12, %c0_76, %c0_77] : memref<29x8x16xf32, #tpu.memory_space<vmem>>, vector<1x1x4xf32>
    %254 = vector.shape_cast %253 : vector<1x1x4xf32> to vector<1x4xf32>
    %cst_78 = arith.constant dense<0.000000e+00> : vector<1x1xf32>
    %255 = tpu.matmul %254, %252, %cst_78 {dimension_numbers = #tpu.dot_dimension_numbers<[1], [0], [0], [1], [0, 0, 1, 1], [], []>, precision = #tpu.contract_precision<fp32>} : vector<1x4xf32>, vector<4x1xf32>, vector<1x1xf32> -> vector<1x1xf32>
    %c13 = arith.constant 13 : index
    %c0_79 = arith.constant 0 : index
    %c0_80 = arith.constant 0 : index
    %256 = vector.load %arg2[%c13, %c0_79, %c0_80] : memref<29x8x16xf32, #tpu.memory_space<vmem>>, vector<1x1x1xf32>
    %257 = vector.shape_cast %256 : vector<1x1x1xf32> to vector<1x1xf32>
    %258 = arith.addf %255, %257 : vector<1x1xf32>
    %cst_81 = arith.constant 0.000000e+00 : f32
    %259 = vector.broadcast %cst_81 : f32 to vector<1x1xf32>
    %260 = arith.maximumf %258, %259 : vector<1x1xf32>
    %c14 = arith.constant 14 : index
    %c0_82 = arith.constant 0 : index
    %c0_83 = arith.constant 0 : index
    %261 = vector.load %arg2[%c14, %c0_82, %c0_83] : memref<29x8x16xf32, #tpu.memory_space<vmem>>, vector<1x4x1xf32>
    %262 = vector.shape_cast %261 : vector<1x4x1xf32> to vector<4x1xf32>
    %cst_84 = arith.constant dense<0.000000e+00> : vector<4x1xf32>
    %263 = tpu.matmul %262, %260, %cst_84 {dimension_numbers = #tpu.dot_dimension_numbers<[1], [0], [0], [1], [0, 0, 1, 1], [], []>, precision = #tpu.contract_precision<fp32>} : vector<4x1xf32>, vector<1x1xf32>, vector<4x1xf32> -> vector<4x1xf32>
    %c15 = arith.constant 15 : index
    %c0_85 = arith.constant 0 : index
    %c0_86 = arith.constant 0 : index
    %264 = vector.load %arg2[%c15, %c0_85, %c0_86] : memref<29x8x16xf32, #tpu.memory_space<vmem>>, vector<1x4x1xf32>
    %265 = vector.shape_cast %264 : vector<1x4x1xf32> to vector<4x1xf32>
    %266 = arith.addf %263, %265 : vector<4x1xf32>
    %cst_87 = arith.constant 3.000000e+00 : f32
    %267 = vector.broadcast %cst_87 : f32 to vector<4x1xf32>
    %268 = arith.addf %266, %267 : vector<4x1xf32>
    %cst_88 = arith.constant 0.000000e+00 : f32
    %cst_89 = arith.constant 6.000000e+00 : f32
    %269 = vector.broadcast %cst_88 : f32 to vector<4x1xf32>
    %270 = arith.maximumf %269, %268 : vector<4x1xf32>
    %271 = vector.broadcast %cst_89 : f32 to vector<4x1xf32>
    %272 = arith.minimumf %271, %270 : vector<4x1xf32>
    %cst_90 = arith.constant 0.166666672 : f32
    %273 = vector.broadcast %cst_90 : f32 to vector<4x1xf32>
    %274 = arith.mulf %272, %273 : vector<4x1xf32>
    %275 = vector.broadcast %274 : vector<4x1xf32> to vector<4x64xf32>
    %276 = arith.mulf %248, %275 : vector<4x64xf32>
    %c16 = arith.constant 16 : index
    %c0_91 = arith.constant 0 : index
    %c0_92 = arith.constant 0 : index
    %277 = vector.load %arg2[%c16, %c0_91, %c0_92] : memref<29x8x16xf32, #tpu.memory_space<vmem>>, vector<1x4x4xf32>
    %278 = vector.shape_cast %277 : vector<1x4x4xf32> to vector<4x4xf32>
    %cst_93 = arith.constant dense<0.000000e+00> : vector<4x64xf32>
    %279 = tpu.matmul %278, %276, %cst_93 {dimension_numbers = #tpu.dot_dimension_numbers<[1], [0], [0], [1], [0, 0, 1, 1], [], []>, precision = #tpu.contract_precision<fp32>} : vector<4x4xf32>, vector<4x64xf32>, vector<4x64xf32> -> vector<4x64xf32>
    %c17 = arith.constant 17 : index
    %c0_94 = arith.constant 0 : index
    %c0_95 = arith.constant 0 : index
    %280 = vector.load %arg2[%c17, %c0_94, %c0_95] : memref<29x8x16xf32, #tpu.memory_space<vmem>>, vector<1x4x1xf32>
    %281 = vector.shape_cast %280 : vector<1x4x1xf32> to vector<4x1xf32>
    %c18 = arith.constant 18 : index
    %c0_96 = arith.constant 0 : index
    %c0_97 = arith.constant 0 : index
    %282 = vector.load %arg2[%c18, %c0_96, %c0_97] : memref<29x8x16xf32, #tpu.memory_space<vmem>>, vector<1x4x1xf32>
    %283 = vector.shape_cast %282 : vector<1x4x1xf32> to vector<4x1xf32>
    %284 = vector.broadcast %281 : vector<4x1xf32> to vector<4x64xf32>
    %285 = arith.mulf %279, %284 : vector<4x64xf32>
    %286 = vector.broadcast %283 : vector<4x1xf32> to vector<4x64xf32>
    %287 = arith.addf %285, %286 : vector<4x64xf32>
    %cst_98 = arith.constant 0.000000e+00 : f32
    %288 = vector.broadcast %cst_98 : f32 to vector<4x64xf32>
    %289 = arith.maximumf %287, %288 : vector<4x64xf32>
    %c19 = arith.constant 19 : index
    %c0_99 = arith.constant 0 : index
    %c0_100 = arith.constant 0 : index
    %290 = vector.load %arg2[%c19, %c0_99, %c0_100] : memref<29x8x16xf32, #tpu.memory_space<vmem>>, vector<1x4x9xf32>
    %291 = vector.shape_cast %290 : vector<1x4x9xf32> to vector<4x9xf32>
    %292 = tpu.iota {dimensions = array<i32: 1>} : vector<1x64xi32>
    %c7_i32_101 = arith.constant 7 : i32
    %293 = vector.broadcast %c7_i32_101 : i32 to vector<1x64xi32>
    %294 = arith.andi %292, %293 : vector<1x64xi32>
    %cst_102 = arith.constant 0.000000e+00 : f32
    %295 = vector.broadcast %cst_102 : f32 to vector<4x9xf32>
    %296 = tpu.concatenate %295, %117, %295 in 1 : vector<4x9xf32>, vector<4x64xf32>, vector<4x9xf32> -> vector<4x82xf32>
    %cst_103 = arith.constant 0.000000e+00 : f32
    %297 = vector.broadcast %cst_103 : f32 to vector<4x64xf32>
    %298 = vector.extract_strided_slice %296 {offsets = [0, 0], sizes = [4, 64], strides = [1, 1]} : vector<4x82xf32> to vector<4x64xf32>
    %c8_i32_104 = arith.constant 8 : i32
    %299 = vector.broadcast %c8_i32_104 : i32 to vector<1x64xi32>
    %300 = arith.cmpi sge, %292, %299 : vector<1x64xi32>
    %c1_i32_105 = arith.constant 1 : i32
    %301 = vector.broadcast %c1_i32_105 : i32 to vector<1x64xi32>
    %302 = arith.cmpi sge, %294, %301 : vector<1x64xi32>
    %303 = arith.andi %300, %302 : vector<1x64xi1>
    %cst_106 = arith.constant 0.000000e+00 : f32
    %304 = vector.shape_cast %303 : vector<1x64xi1> to vector<1x64xi1>
    %305 = vector.broadcast %304 : vector<1x64xi1> to vector<4x64xi1>
    %306 = vector.broadcast %cst_106 : f32 to vector<4x64xf32>
    %307 = arith.select %305, %298, %306 : vector<4x64xi1>, vector<4x64xf32>
    %308 = vector.extract_strided_slice %291 {offsets = [0, 0], sizes = [4, 1], strides = [1, 1]} : vector<4x9xf32> to vector<4x1xf32>
    %309 = vector.broadcast %308 : vector<4x1xf32> to vector<4x64xf32>
    %310 = arith.mulf %307, %309 : vector<4x64xf32>
    %311 = arith.addf %297, %310 : vector<4x64xf32>
    %312 = vector.extract_strided_slice %296 {offsets = [0, 1], sizes = [4, 64], strides = [1, 1]} : vector<4x82xf32> to vector<4x64xf32>
    %c8_i32_107 = arith.constant 8 : i32
    %313 = vector.broadcast %c8_i32_107 : i32 to vector<1x64xi32>
    %314 = arith.cmpi sge, %292, %313 : vector<1x64xi32>
    %cst_108 = arith.constant 0.000000e+00 : f32
    %315 = vector.shape_cast %314 : vector<1x64xi1> to vector<1x64xi1>
    %316 = vector.broadcast %315 : vector<1x64xi1> to vector<4x64xi1>
    %317 = vector.broadcast %cst_108 : f32 to vector<4x64xf32>
    %318 = arith.select %316, %312, %317 : vector<4x64xi1>, vector<4x64xf32>
    %319 = vector.extract_strided_slice %291 {offsets = [0, 1], sizes = [4, 1], strides = [1, 1]} : vector<4x9xf32> to vector<4x1xf32>
    %320 = vector.broadcast %319 : vector<4x1xf32> to vector<4x64xf32>
    %321 = arith.mulf %318, %320 : vector<4x64xf32>
    %322 = arith.addf %311, %321 : vector<4x64xf32>
    %323 = vector.extract_strided_slice %296 {offsets = [0, 2], sizes = [4, 64], strides = [1, 1]} : vector<4x82xf32> to vector<4x64xf32>
    %c8_i32_109 = arith.constant 8 : i32
    %324 = vector.broadcast %c8_i32_109 : i32 to vector<1x64xi32>
    %325 = arith.cmpi sge, %292, %324 : vector<1x64xi32>
    %c6_i32 = arith.constant 6 : i32
    %326 = vector.broadcast %c6_i32 : i32 to vector<1x64xi32>
    %327 = arith.cmpi sle, %294, %326 : vector<1x64xi32>
    %328 = arith.andi %325, %327 : vector<1x64xi1>
    %cst_110 = arith.constant 0.000000e+00 : f32
    %329 = vector.shape_cast %328 : vector<1x64xi1> to vector<1x64xi1>
    %330 = vector.broadcast %329 : vector<1x64xi1> to vector<4x64xi1>
    %331 = vector.broadcast %cst_110 : f32 to vector<4x64xf32>
    %332 = arith.select %330, %323, %331 : vector<4x64xi1>, vector<4x64xf32>
    %333 = vector.extract_strided_slice %291 {offsets = [0, 2], sizes = [4, 1], strides = [1, 1]} : vector<4x9xf32> to vector<4x1xf32>
    %334 = vector.broadcast %333 : vector<4x1xf32> to vector<4x64xf32>
    %335 = arith.mulf %332, %334 : vector<4x64xf32>
    %336 = arith.addf %322, %335 : vector<4x64xf32>
    %337 = vector.extract_strided_slice %296 {offsets = [0, 8], sizes = [4, 64], strides = [1, 1]} : vector<4x82xf32> to vector<4x64xf32>
    %c1_i32_111 = arith.constant 1 : i32
    %338 = vector.broadcast %c1_i32_111 : i32 to vector<1x64xi32>
    %339 = arith.cmpi sge, %294, %338 : vector<1x64xi32>
    %cst_112 = arith.constant 0.000000e+00 : f32
    %340 = vector.shape_cast %339 : vector<1x64xi1> to vector<1x64xi1>
    %341 = vector.broadcast %340 : vector<1x64xi1> to vector<4x64xi1>
    %342 = vector.broadcast %cst_112 : f32 to vector<4x64xf32>
    %343 = arith.select %341, %337, %342 : vector<4x64xi1>, vector<4x64xf32>
    %344 = vector.extract_strided_slice %291 {offsets = [0, 3], sizes = [4, 1], strides = [1, 1]} : vector<4x9xf32> to vector<4x1xf32>
    %345 = vector.broadcast %344 : vector<4x1xf32> to vector<4x64xf32>
    %346 = arith.mulf %343, %345 : vector<4x64xf32>
    %347 = arith.addf %336, %346 : vector<4x64xf32>
    %348 = vector.extract_strided_slice %296 {offsets = [0, 9], sizes = [4, 64], strides = [1, 1]} : vector<4x82xf32> to vector<4x64xf32>
    %349 = vector.extract_strided_slice %291 {offsets = [0, 4], sizes = [4, 1], strides = [1, 1]} : vector<4x9xf32> to vector<4x1xf32>
    %350 = vector.broadcast %349 : vector<4x1xf32> to vector<4x64xf32>
    %351 = arith.mulf %348, %350 : vector<4x64xf32>
    %352 = arith.addf %347, %351 : vector<4x64xf32>
    %353 = vector.extract_strided_slice %296 {offsets = [0, 10], sizes = [4, 64], strides = [1, 1]} : vector<4x82xf32> to vector<4x64xf32>
    %c6_i32_113 = arith.constant 6 : i32
    %354 = vector.broadcast %c6_i32_113 : i32 to vector<1x64xi32>
    %355 = arith.cmpi sle, %294, %354 : vector<1x64xi32>
    %cst_114 = arith.constant 0.000000e+00 : f32
    %356 = vector.shape_cast %355 : vector<1x64xi1> to vector<1x64xi1>
    %357 = vector.broadcast %356 : vector<1x64xi1> to vector<4x64xi1>
    %358 = vector.broadcast %cst_114 : f32 to vector<4x64xf32>
    %359 = arith.select %357, %353, %358 : vector<4x64xi1>, vector<4x64xf32>
    %360 = vector.extract_strided_slice %291 {offsets = [0, 5], sizes = [4, 1], strides = [1, 1]} : vector<4x9xf32> to vector<4x1xf32>
    %361 = vector.broadcast %360 : vector<4x1xf32> to vector<4x64xf32>
    %362 = arith.mulf %359, %361 : vector<4x64xf32>
    %363 = arith.addf %352, %362 : vector<4x64xf32>
    %364 = vector.extract_strided_slice %296 {offsets = [0, 16], sizes = [4, 64], strides = [1, 1]} : vector<4x82xf32> to vector<4x64xf32>
    %c56_i32 = arith.constant 56 : i32
    %365 = vector.broadcast %c56_i32 : i32 to vector<1x64xi32>
    %366 = arith.cmpi slt, %292, %365 : vector<1x64xi32>
    %c1_i32_115 = arith.constant 1 : i32
    %367 = vector.broadcast %c1_i32_115 : i32 to vector<1x64xi32>
    %368 = arith.cmpi sge, %294, %367 : vector<1x64xi32>
    %369 = arith.andi %366, %368 : vector<1x64xi1>
    %cst_116 = arith.constant 0.000000e+00 : f32
    %370 = vector.shape_cast %369 : vector<1x64xi1> to vector<1x64xi1>
    %371 = vector.broadcast %370 : vector<1x64xi1> to vector<4x64xi1>
    %372 = vector.broadcast %cst_116 : f32 to vector<4x64xf32>
    %373 = arith.select %371, %364, %372 : vector<4x64xi1>, vector<4x64xf32>
    %374 = vector.extract_strided_slice %291 {offsets = [0, 6], sizes = [4, 1], strides = [1, 1]} : vector<4x9xf32> to vector<4x1xf32>
    %375 = vector.broadcast %374 : vector<4x1xf32> to vector<4x64xf32>
    %376 = arith.mulf %373, %375 : vector<4x64xf32>
    %377 = arith.addf %363, %376 : vector<4x64xf32>
    %378 = vector.extract_strided_slice %296 {offsets = [0, 17], sizes = [4, 64], strides = [1, 1]} : vector<4x82xf32> to vector<4x64xf32>
    %c56_i32_117 = arith.constant 56 : i32
    %379 = vector.broadcast %c56_i32_117 : i32 to vector<1x64xi32>
    %380 = arith.cmpi slt, %292, %379 : vector<1x64xi32>
    %cst_118 = arith.constant 0.000000e+00 : f32
    %381 = vector.shape_cast %380 : vector<1x64xi1> to vector<1x64xi1>
    %382 = vector.broadcast %381 : vector<1x64xi1> to vector<4x64xi1>
    %383 = vector.broadcast %cst_118 : f32 to vector<4x64xf32>
    %384 = arith.select %382, %378, %383 : vector<4x64xi1>, vector<4x64xf32>
    %385 = vector.extract_strided_slice %291 {offsets = [0, 7], sizes = [4, 1], strides = [1, 1]} : vector<4x9xf32> to vector<4x1xf32>
    %386 = vector.broadcast %385 : vector<4x1xf32> to vector<4x64xf32>
    %387 = arith.mulf %384, %386 : vector<4x64xf32>
    %388 = arith.addf %377, %387 : vector<4x64xf32>
    %389 = vector.extract_strided_slice %296 {offsets = [0, 18], sizes = [4, 64], strides = [1, 1]} : vector<4x82xf32> to vector<4x64xf32>
    %c56_i32_119 = arith.constant 56 : i32
    %390 = vector.broadcast %c56_i32_119 : i32 to vector<1x64xi32>
    %391 = arith.cmpi slt, %292, %390 : vector<1x64xi32>
    %c6_i32_120 = arith.constant 6 : i32
    %392 = vector.broadcast %c6_i32_120 : i32 to vector<1x64xi32>
    %393 = arith.cmpi sle, %294, %392 : vector<1x64xi32>
    %394 = arith.andi %391, %393 : vector<1x64xi1>
    %cst_121 = arith.constant 0.000000e+00 : f32
    %395 = vector.shape_cast %394 : vector<1x64xi1> to vector<1x64xi1>
    %396 = vector.broadcast %395 : vector<1x64xi1> to vector<4x64xi1>
    %397 = vector.broadcast %cst_121 : f32 to vector<4x64xf32>
    %398 = arith.select %396, %389, %397 : vector<4x64xi1>, vector<4x64xf32>
    %399 = vector.extract_strided_slice %291 {offsets = [0, 8], sizes = [4, 1], strides = [1, 1]} : vector<4x9xf32> to vector<4x1xf32>
    %400 = vector.broadcast %399 : vector<4x1xf32> to vector<4x64xf32>
    %401 = arith.mulf %398, %400 : vector<4x64xf32>
    %402 = arith.addf %388, %401 : vector<4x64xf32>
    %c20 = arith.constant 20 : index
    %c0_122 = arith.constant 0 : index
    %c0_123 = arith.constant 0 : index
    %403 = vector.load %arg2[%c20, %c0_122, %c0_123] : memref<29x8x16xf32, #tpu.memory_space<vmem>>, vector<1x4x1xf32>
    %404 = vector.shape_cast %403 : vector<1x4x1xf32> to vector<4x1xf32>
    %c21 = arith.constant 21 : index
    %c0_124 = arith.constant 0 : index
    %c0_125 = arith.constant 0 : index
    %405 = vector.load %arg2[%c21, %c0_124, %c0_125] : memref<29x8x16xf32, #tpu.memory_space<vmem>>, vector<1x4x1xf32>
    %406 = vector.shape_cast %405 : vector<1x4x1xf32> to vector<4x1xf32>
    %407 = vector.broadcast %404 : vector<4x1xf32> to vector<4x64xf32>
    %408 = arith.mulf %402, %407 : vector<4x64xf32>
    %409 = vector.broadcast %406 : vector<4x1xf32> to vector<4x64xf32>
    %410 = arith.addf %408, %409 : vector<4x64xf32>
    %cst_126 = arith.constant 3.000000e+00 : f32
    %411 = vector.broadcast %cst_126 : f32 to vector<4x64xf32>
    %412 = arith.addf %410, %411 : vector<4x64xf32>
    %cst_127 = arith.constant 0.000000e+00 : f32
    %cst_128 = arith.constant 6.000000e+00 : f32
    %413 = vector.broadcast %cst_127 : f32 to vector<4x64xf32>
    %414 = arith.maximumf %413, %412 : vector<4x64xf32>
    %415 = vector.broadcast %cst_128 : f32 to vector<4x64xf32>
    %416 = arith.minimumf %415, %414 : vector<4x64xf32>
    %cst_129 = arith.constant 0.166666672 : f32
    %417 = vector.broadcast %cst_129 : f32 to vector<4x64xf32>
    %418 = arith.mulf %416, %417 : vector<4x64xf32>
    %419 = arith.mulf %410, %418 : vector<4x64xf32>
    %c22 = arith.constant 22 : index
    %c0_130 = arith.constant 0 : index
    %c0_131 = arith.constant 0 : index
    %420 = vector.load %arg2[%c22, %c0_130, %c0_131] : memref<29x8x16xf32, #tpu.memory_space<vmem>>, vector<1x4x9xf32>
    %421 = vector.shape_cast %420 : vector<1x4x9xf32> to vector<4x9xf32>
    %422 = tpu.iota {dimensions = array<i32: 1>} : vector<1x64xi32>
    %c7_i32_132 = arith.constant 7 : i32
    %423 = vector.broadcast %c7_i32_132 : i32 to vector<1x64xi32>
    %424 = arith.andi %422, %423 : vector<1x64xi32>
    %cst_133 = arith.constant 0.000000e+00 : f32
    %425 = vector.broadcast %cst_133 : f32 to vector<4x9xf32>
    %426 = tpu.concatenate %425, %289, %425 in 1 : vector<4x9xf32>, vector<4x64xf32>, vector<4x9xf32> -> vector<4x82xf32>
    %cst_134 = arith.constant 0.000000e+00 : f32
    %427 = vector.broadcast %cst_134 : f32 to vector<4x64xf32>
    %428 = vector.extract_strided_slice %426 {offsets = [0, 0], sizes = [4, 64], strides = [1, 1]} : vector<4x82xf32> to vector<4x64xf32>
    %c8_i32_135 = arith.constant 8 : i32
    %429 = vector.broadcast %c8_i32_135 : i32 to vector<1x64xi32>
    %430 = arith.cmpi sge, %422, %429 : vector<1x64xi32>
    %c1_i32_136 = arith.constant 1 : i32
    %431 = vector.broadcast %c1_i32_136 : i32 to vector<1x64xi32>
    %432 = arith.cmpi sge, %424, %431 : vector<1x64xi32>
    %433 = arith.andi %430, %432 : vector<1x64xi1>
    %cst_137 = arith.constant 0.000000e+00 : f32
    %434 = vector.shape_cast %433 : vector<1x64xi1> to vector<1x64xi1>
    %435 = vector.broadcast %434 : vector<1x64xi1> to vector<4x64xi1>
    %436 = vector.broadcast %cst_137 : f32 to vector<4x64xf32>
    %437 = arith.select %435, %428, %436 : vector<4x64xi1>, vector<4x64xf32>
    %438 = vector.extract_strided_slice %421 {offsets = [0, 0], sizes = [4, 1], strides = [1, 1]} : vector<4x9xf32> to vector<4x1xf32>
    %439 = vector.broadcast %438 : vector<4x1xf32> to vector<4x64xf32>
    %440 = arith.mulf %437, %439 : vector<4x64xf32>
    %441 = arith.addf %427, %440 : vector<4x64xf32>
    %442 = vector.extract_strided_slice %426 {offsets = [0, 1], sizes = [4, 64], strides = [1, 1]} : vector<4x82xf32> to vector<4x64xf32>
    %c8_i32_138 = arith.constant 8 : i32
    %443 = vector.broadcast %c8_i32_138 : i32 to vector<1x64xi32>
    %444 = arith.cmpi sge, %422, %443 : vector<1x64xi32>
    %cst_139 = arith.constant 0.000000e+00 : f32
    %445 = vector.shape_cast %444 : vector<1x64xi1> to vector<1x64xi1>
    %446 = vector.broadcast %445 : vector<1x64xi1> to vector<4x64xi1>
    %447 = vector.broadcast %cst_139 : f32 to vector<4x64xf32>
    %448 = arith.select %446, %442, %447 : vector<4x64xi1>, vector<4x64xf32>
    %449 = vector.extract_strided_slice %421 {offsets = [0, 1], sizes = [4, 1], strides = [1, 1]} : vector<4x9xf32> to vector<4x1xf32>
    %450 = vector.broadcast %449 : vector<4x1xf32> to vector<4x64xf32>
    %451 = arith.mulf %448, %450 : vector<4x64xf32>
    %452 = arith.addf %441, %451 : vector<4x64xf32>
    %453 = vector.extract_strided_slice %426 {offsets = [0, 2], sizes = [4, 64], strides = [1, 1]} : vector<4x82xf32> to vector<4x64xf32>
    %c8_i32_140 = arith.constant 8 : i32
    %454 = vector.broadcast %c8_i32_140 : i32 to vector<1x64xi32>
    %455 = arith.cmpi sge, %422, %454 : vector<1x64xi32>
    %c6_i32_141 = arith.constant 6 : i32
    %456 = vector.broadcast %c6_i32_141 : i32 to vector<1x64xi32>
    %457 = arith.cmpi sle, %424, %456 : vector<1x64xi32>
    %458 = arith.andi %455, %457 : vector<1x64xi1>
    %cst_142 = arith.constant 0.000000e+00 : f32
    %459 = vector.shape_cast %458 : vector<1x64xi1> to vector<1x64xi1>
    %460 = vector.broadcast %459 : vector<1x64xi1> to vector<4x64xi1>
    %461 = vector.broadcast %cst_142 : f32 to vector<4x64xf32>
    %462 = arith.select %460, %453, %461 : vector<4x64xi1>, vector<4x64xf32>
    %463 = vector.extract_strided_slice %421 {offsets = [0, 2], sizes = [4, 1], strides = [1, 1]} : vector<4x9xf32> to vector<4x1xf32>
    %464 = vector.broadcast %463 : vector<4x1xf32> to vector<4x64xf32>
    %465 = arith.mulf %462, %464 : vector<4x64xf32>
    %466 = arith.addf %452, %465 : vector<4x64xf32>
    %467 = vector.extract_strided_slice %426 {offsets = [0, 8], sizes = [4, 64], strides = [1, 1]} : vector<4x82xf32> to vector<4x64xf32>
    %c1_i32_143 = arith.constant 1 : i32
    %468 = vector.broadcast %c1_i32_143 : i32 to vector<1x64xi32>
    %469 = arith.cmpi sge, %424, %468 : vector<1x64xi32>
    %cst_144 = arith.constant 0.000000e+00 : f32
    %470 = vector.shape_cast %469 : vector<1x64xi1> to vector<1x64xi1>
    %471 = vector.broadcast %470 : vector<1x64xi1> to vector<4x64xi1>
    %472 = vector.broadcast %cst_144 : f32 to vector<4x64xf32>
    %473 = arith.select %471, %467, %472 : vector<4x64xi1>, vector<4x64xf32>
    %474 = vector.extract_strided_slice %421 {offsets = [0, 3], sizes = [4, 1], strides = [1, 1]} : vector<4x9xf32> to vector<4x1xf32>
    %475 = vector.broadcast %474 : vector<4x1xf32> to vector<4x64xf32>
    %476 = arith.mulf %473, %475 : vector<4x64xf32>
    %477 = arith.addf %466, %476 : vector<4x64xf32>
    %478 = vector.extract_strided_slice %426 {offsets = [0, 9], sizes = [4, 64], strides = [1, 1]} : vector<4x82xf32> to vector<4x64xf32>
    %479 = vector.extract_strided_slice %421 {offsets = [0, 4], sizes = [4, 1], strides = [1, 1]} : vector<4x9xf32> to vector<4x1xf32>
    %480 = vector.broadcast %479 : vector<4x1xf32> to vector<4x64xf32>
    %481 = arith.mulf %478, %480 : vector<4x64xf32>
    %482 = arith.addf %477, %481 : vector<4x64xf32>
    %483 = vector.extract_strided_slice %426 {offsets = [0, 10], sizes = [4, 64], strides = [1, 1]} : vector<4x82xf32> to vector<4x64xf32>
    %c6_i32_145 = arith.constant 6 : i32
    %484 = vector.broadcast %c6_i32_145 : i32 to vector<1x64xi32>
    %485 = arith.cmpi sle, %424, %484 : vector<1x64xi32>
    %cst_146 = arith.constant 0.000000e+00 : f32
    %486 = vector.shape_cast %485 : vector<1x64xi1> to vector<1x64xi1>
    %487 = vector.broadcast %486 : vector<1x64xi1> to vector<4x64xi1>
    %488 = vector.broadcast %cst_146 : f32 to vector<4x64xf32>
    %489 = arith.select %487, %483, %488 : vector<4x64xi1>, vector<4x64xf32>
    %490 = vector.extract_strided_slice %421 {offsets = [0, 5], sizes = [4, 1], strides = [1, 1]} : vector<4x9xf32> to vector<4x1xf32>
    %491 = vector.broadcast %490 : vector<4x1xf32> to vector<4x64xf32>
    %492 = arith.mulf %489, %491 : vector<4x64xf32>
    %493 = arith.addf %482, %492 : vector<4x64xf32>
    %494 = vector.extract_strided_slice %426 {offsets = [0, 16], sizes = [4, 64], strides = [1, 1]} : vector<4x82xf32> to vector<4x64xf32>
    %c56_i32_147 = arith.constant 56 : i32
    %495 = vector.broadcast %c56_i32_147 : i32 to vector<1x64xi32>
    %496 = arith.cmpi slt, %422, %495 : vector<1x64xi32>
    %c1_i32_148 = arith.constant 1 : i32
    %497 = vector.broadcast %c1_i32_148 : i32 to vector<1x64xi32>
    %498 = arith.cmpi sge, %424, %497 : vector<1x64xi32>
    %499 = arith.andi %496, %498 : vector<1x64xi1>
    %cst_149 = arith.constant 0.000000e+00 : f32
    %500 = vector.shape_cast %499 : vector<1x64xi1> to vector<1x64xi1>
    %501 = vector.broadcast %500 : vector<1x64xi1> to vector<4x64xi1>
    %502 = vector.broadcast %cst_149 : f32 to vector<4x64xf32>
    %503 = arith.select %501, %494, %502 : vector<4x64xi1>, vector<4x64xf32>
    %504 = vector.extract_strided_slice %421 {offsets = [0, 6], sizes = [4, 1], strides = [1, 1]} : vector<4x9xf32> to vector<4x1xf32>
    %505 = vector.broadcast %504 : vector<4x1xf32> to vector<4x64xf32>
    %506 = arith.mulf %503, %505 : vector<4x64xf32>
    %507 = arith.addf %493, %506 : vector<4x64xf32>
    %508 = vector.extract_strided_slice %426 {offsets = [0, 17], sizes = [4, 64], strides = [1, 1]} : vector<4x82xf32> to vector<4x64xf32>
    %c56_i32_150 = arith.constant 56 : i32
    %509 = vector.broadcast %c56_i32_150 : i32 to vector<1x64xi32>
    %510 = arith.cmpi slt, %422, %509 : vector<1x64xi32>
    %cst_151 = arith.constant 0.000000e+00 : f32
    %511 = vector.shape_cast %510 : vector<1x64xi1> to vector<1x64xi1>
    %512 = vector.broadcast %511 : vector<1x64xi1> to vector<4x64xi1>
    %513 = vector.broadcast %cst_151 : f32 to vector<4x64xf32>
    %514 = arith.select %512, %508, %513 : vector<4x64xi1>, vector<4x64xf32>
    %515 = vector.extract_strided_slice %421 {offsets = [0, 7], sizes = [4, 1], strides = [1, 1]} : vector<4x9xf32> to vector<4x1xf32>
    %516 = vector.broadcast %515 : vector<4x1xf32> to vector<4x64xf32>
    %517 = arith.mulf %514, %516 : vector<4x64xf32>
    %518 = arith.addf %507, %517 : vector<4x64xf32>
    %519 = vector.extract_strided_slice %426 {offsets = [0, 18], sizes = [4, 64], strides = [1, 1]} : vector<4x82xf32> to vector<4x64xf32>
    %c56_i32_152 = arith.constant 56 : i32
    %520 = vector.broadcast %c56_i32_152 : i32 to vector<1x64xi32>
    %521 = arith.cmpi slt, %422, %520 : vector<1x64xi32>
    %c6_i32_153 = arith.constant 6 : i32
    %522 = vector.broadcast %c6_i32_153 : i32 to vector<1x64xi32>
    %523 = arith.cmpi sle, %424, %522 : vector<1x64xi32>
    %524 = arith.andi %521, %523 : vector<1x64xi1>
    %cst_154 = arith.constant 0.000000e+00 : f32
    %525 = vector.shape_cast %524 : vector<1x64xi1> to vector<1x64xi1>
    %526 = vector.broadcast %525 : vector<1x64xi1> to vector<4x64xi1>
    %527 = vector.broadcast %cst_154 : f32 to vector<4x64xf32>
    %528 = arith.select %526, %519, %527 : vector<4x64xi1>, vector<4x64xf32>
    %529 = vector.extract_strided_slice %421 {offsets = [0, 8], sizes = [4, 1], strides = [1, 1]} : vector<4x9xf32> to vector<4x1xf32>
    %530 = vector.broadcast %529 : vector<4x1xf32> to vector<4x64xf32>
    %531 = arith.mulf %528, %530 : vector<4x64xf32>
    %532 = arith.addf %518, %531 : vector<4x64xf32>
    %c23 = arith.constant 23 : index
    %c0_155 = arith.constant 0 : index
    %c0_156 = arith.constant 0 : index
    %533 = vector.load %arg2[%c23, %c0_155, %c0_156] : memref<29x8x16xf32, #tpu.memory_space<vmem>>, vector<1x4x1xf32>
    %534 = vector.shape_cast %533 : vector<1x4x1xf32> to vector<4x1xf32>
    %c24 = arith.constant 24 : index
    %c0_157 = arith.constant 0 : index
    %c0_158 = arith.constant 0 : index
    %535 = vector.load %arg2[%c24, %c0_157, %c0_158] : memref<29x8x16xf32, #tpu.memory_space<vmem>>, vector<1x4x1xf32>
    %536 = vector.shape_cast %535 : vector<1x4x1xf32> to vector<4x1xf32>
    %537 = vector.broadcast %534 : vector<4x1xf32> to vector<4x64xf32>
    %538 = arith.mulf %532, %537 : vector<4x64xf32>
    %539 = vector.broadcast %536 : vector<4x1xf32> to vector<4x64xf32>
    %540 = arith.addf %538, %539 : vector<4x64xf32>
    %cst_159 = arith.constant 3.000000e+00 : f32
    %541 = vector.broadcast %cst_159 : f32 to vector<4x64xf32>
    %542 = arith.addf %540, %541 : vector<4x64xf32>
    %cst_160 = arith.constant 0.000000e+00 : f32
    %cst_161 = arith.constant 6.000000e+00 : f32
    %543 = vector.broadcast %cst_160 : f32 to vector<4x64xf32>
    %544 = arith.maximumf %543, %542 : vector<4x64xf32>
    %545 = vector.broadcast %cst_161 : f32 to vector<4x64xf32>
    %546 = arith.minimumf %545, %544 : vector<4x64xf32>
    %cst_162 = arith.constant 0.166666672 : f32
    %547 = vector.broadcast %cst_162 : f32 to vector<4x64xf32>
    %548 = arith.mulf %546, %547 : vector<4x64xf32>
    %549 = arith.mulf %540, %548 : vector<4x64xf32>
    %c25 = arith.constant 25 : index
    %c0_163 = arith.constant 0 : index
    %c0_164 = arith.constant 0 : index
    %550 = vector.load %arg2[%c25, %c0_163, %c0_164] : memref<29x8x16xf32, #tpu.memory_space<vmem>>, vector<1x8x4xf32>
    %551 = vector.shape_cast %550 : vector<1x8x4xf32> to vector<8x4xf32>
    %cst_165 = arith.constant dense<0.000000e+00> : vector<8x64xf32>
    %552 = tpu.matmul %551, %419, %cst_165 {dimension_numbers = #tpu.dot_dimension_numbers<[1], [0], [0], [1], [0, 0, 1, 1], [], []>, precision = #tpu.contract_precision<fp32>} : vector<8x4xf32>, vector<4x64xf32>, vector<8x64xf32> -> vector<8x64xf32>
    %c26 = arith.constant 26 : index
    %c0_166 = arith.constant 0 : index
    %c0_167 = arith.constant 0 : index
    %553 = vector.load %arg2[%c26, %c0_166, %c0_167] : memref<29x8x16xf32, #tpu.memory_space<vmem>>, vector<1x8x4xf32>
    %554 = vector.shape_cast %553 : vector<1x8x4xf32> to vector<8x4xf32>
    %cst_168 = arith.constant dense<0.000000e+00> : vector<8x64xf32>
    %555 = tpu.matmul %554, %549, %cst_168 {dimension_numbers = #tpu.dot_dimension_numbers<[1], [0], [0], [1], [0, 0, 1, 1], [], []>, precision = #tpu.contract_precision<fp32>} : vector<8x4xf32>, vector<4x64xf32>, vector<8x64xf32> -> vector<8x64xf32>
    %556 = arith.addf %552, %555 : vector<8x64xf32>
    %c27 = arith.constant 27 : index
    %c0_169 = arith.constant 0 : index
    %c0_170 = arith.constant 0 : index
    %557 = vector.load %arg2[%c27, %c0_169, %c0_170] : memref<29x8x16xf32, #tpu.memory_space<vmem>>, vector<1x8x1xf32>
    %558 = vector.shape_cast %557 : vector<1x8x1xf32> to vector<8x1xf32>
    %c28 = arith.constant 28 : index
    %c0_171 = arith.constant 0 : index
    %c0_172 = arith.constant 0 : index
    %559 = vector.load %arg2[%c28, %c0_171, %c0_172] : memref<29x8x16xf32, #tpu.memory_space<vmem>>, vector<1x8x1xf32>
    %560 = vector.shape_cast %559 : vector<1x8x1xf32> to vector<8x1xf32>
    %561 = vector.broadcast %558 : vector<8x1xf32> to vector<8x64xf32>
    %562 = arith.mulf %556, %561 : vector<8x64xf32>
    %563 = vector.broadcast %560 : vector<8x1xf32> to vector<8x64xf32>
    %564 = arith.addf %562, %563 : vector<8x64xf32>
    %cst_173 = arith.constant 3.000000e+00 : f32
    %565 = vector.broadcast %cst_173 : f32 to vector<8x64xf32>
    %566 = arith.addf %564, %565 : vector<8x64xf32>
    %cst_174 = arith.constant 0.000000e+00 : f32
    %cst_175 = arith.constant 6.000000e+00 : f32
    %567 = vector.broadcast %cst_174 : f32 to vector<8x64xf32>
    %568 = arith.maximumf %567, %566 : vector<8x64xf32>
    %569 = vector.broadcast %cst_175 : f32 to vector<8x64xf32>
    %570 = arith.minimumf %569, %568 : vector<8x64xf32>
    %cst_176 = arith.constant 0.166666672 : f32
    %571 = vector.broadcast %cst_176 : f32 to vector<8x64xf32>
    %572 = arith.mulf %570, %571 : vector<8x64xf32>
    %573 = arith.mulf %564, %572 : vector<8x64xf32>
    %c0_177 = arith.constant 0 : index
    %c0_178 = arith.constant 0 : index
    %c0_179 = arith.constant 0 : index
    %574 = vector.load %arg3[%c0_177, %c0_178, %c0_179] : memref<1x8x64xf32, #tpu.memory_space<vmem>>, vector<1x8x64xf32>
    %575 = vector.shape_cast %574 : vector<1x8x64xf32> to vector<8x64xf32>
    %576 = vector.shape_cast %573 : vector<8x64xf32> to vector<1x8x64xf32>
    tpu.vector_store %arg3[%c0_177, %c0_178, %c0_179], %576 {strides = array<i32>} : memref<1x8x64xf32, #tpu.memory_space<vmem>>, vector<1x8x64xf32>,
    return
  }
  func.func @transform_0(%arg0: i32) -> (i32, i32, i32, i32) {
    %c0_i32 = arith.constant 0 : i32
    %c0_i32_0 = arith.constant 0 : i32
    %c0_i32_1 = arith.constant 0 : i32
    %c0_i32_2 = arith.constant 0 : i32
    return %arg0, %c0_i32, %c0_i32_0, %c0_i32_1 : i32, i32, i32, i32
  }
  func.func @transform_1(%arg0: i32) -> (i32, i32, i32) {
    %c0_i32 = arith.constant 0 : i32
    %c0_i32_0 = arith.constant 0 : i32
    %c0_i32_1 = arith.constant 0 : i32
    %c0_i32_2 = arith.constant 0 : i32
    return %c0_i32, %c0_i32_0, %c0_i32_1 : i32, i32, i32
  }
  func.func @transform_2(%arg0: i32) -> (i32, i32, i32) {
    %c0_i32 = arith.constant 0 : i32
    %c0_i32_0 = arith.constant 0 : i32
    %c0_i32_1 = arith.constant 0 : i32
    return %arg0, %c0_i32, %c0_i32_0 : i32, i32, i32
  }
}

</mosaic_0001>

<bundles_post_ra>
// kernel: tpu_custom_call.1
= control target key start
LH: loop header
LB: loop body
LE: loop exit
PB: predicated region body
PF: predicated region fallthrough
CT: control target
= control target key end

     0   :  { %7 = vsyncpa [#allocation3], 0  ;;  %s6766_s0 = inlined_call_operand.vmem [shape: f32[2,4,4,64], index: 0, kind: input, shape index: {}]   ;;  %s6767_s1 = inlined_call_operand.vmem [shape: f32[29,8,16], index: 1, kind: input, shape index: {}]   ;;  %s6768_s2 = inlined_call_operand.hbm [shape: f32[2,8,64], index: 2, kind: output, shape index: {}]  }
   0x1   :  { %9 = vsyncpa [#allocation3 + $0x1], 0  ;;  %s6042_s9 = smov 0   ;;  %s6044_s10 = smov 0  }
   0x2   :  { %s6046_s11 = smov 0   ;;  %s6048_s12 = smov 0  }
   0x3 LB: > { %s6063_s13 = sadd.s32 4294967295, %s6004_s12   ;;  %s5381_s14 = sadd.s32 4294967294, %s6004_s12   ;;  %s6004_s12 = sphi %s6048_s12, %s6786_s12   ;;  %s6000_s11 = sphi %s6046_s11, %s6785_s11   ;;  %s5996_s10 = sphi %s6044_s10, %s6784_s10   ;;  %s5992_s9 = sphi %s6042_s9, %s6783_s9  }
   0x4   : > { %s6067_s15 = sadd.s32 1, %s6004_s12   ;;  %s69_s16 = sadd.s32 1, %s6000_s11 }
   0x5   : > { %s66_s17 = ssub.s32 %s6004_s12, %s6067_s15  ;;  %p79_p0 = scmp.ne.s32.totalorder %s6000_s11, %s5996_s10 }
   0x6   : > { %p67_p1 = scmp.eq.s32.totalorder %s66_s17, 0  ;;  %p80_p2 = scmp.eq.s32.totalorder %s6063_s13, 1 }
   0x7   : > { %p85_p3 = scmp.ne.s32.totalorder %s5996_s10, %s5992_s9  ;;  %p86_p4 = scmp.eq.s32.totalorder %s5381_s14, 1 }
   0x8   : > { %s6078_s18 = scalar_select %p67_p1, %s6000_s11, %s69_s16  }
   0x9   : > { %p6080_p5 = por %p80_p2, %p79_p0  ;;  %p6084_p6 = por %p86_p4, %p85_p3 }
   0xa   : > { %p5384_p7 = scmp.ge.s32.totalorder %s6004_s12, 1  ;;  %p115_p8 = scmp.lt.s32.totalorder %s6004_s12, 3 }
   0xc   : > { %p116_p9 = pnand %p5384_p7, %p115_p8 }
   0xd   : > { %p137_p10 = scmp.lt.s32.totalorder (!%p116_p9), %s6063_s13, 1  ;;  %s6009_s28 = smov (!%p116_p9), 9  }
   0xe   : > { %119 = sbr.rel (%p116_p9) target bundleno = 2280 (0x8e8), region = 28  ;;  %s6016_s29 = smov (!%p116_p9), 127  }
   0xf   : > { %s6017_s30 = smov (!%p116_p9), 120   ;;  %s6018_s3 = smov (!%p116_p9), 119  }
  0x10   : > { %s6022_s26 = smov (!%p116_p9), 118   ;;  %s6023_s4 = smov (!%p116_p9), 112  }
  0x11   : > { %s6024_s5 = smov (!%p116_p9), 111   ;;  %s6025_s6 = smov (!%p116_p9), 110  }
  0x12   : > { %s134_s25 = sand.u32 (!%p116_p9), 1, %s5996_s10   ;;  %s6026_s8 = smov (!%p116_p9), [#allocation2]  }
  0x13   : > { %v149_v0 = vld [vmem:[%s6767_s1] sm:$0xf]  ;;  %v6006_v1 = vmov 4   ;;  %s138_s23 = scalar_select %p137_p10, %s6063_s13, 1  ;;  %v6007_v2 = vmov 5   ;;  %v6008_v5 = vmov 7   ;;  %v150_v41 = vlaneseq }
  0x14   : > { %5903 = vset.pattern.permute.xlu1 %v6006_v1  ;;  %5904 = vset.pattern.permute.xlu0 %v6007_v2  ;;  %v6010_v8 = vmov 8   ;;  %v6011_v9 = vmov 0   ;;  %v6012_v10 = vmov 1   ;;  %v6013_v11 = vmov 2   ;;  %v5391_v31 = vld [vmem:[%s6767_s1 + $0x8] sm:$0xf] }
  0x15   : > { %230 = vperm.xlu1 %5903, %v149_v0   ;;  %s5423_s24 = sshll.u32 %s138_s23, 4  ;;  %v6014_v12 = vmov 3   ;;  %v6015_v13 = vmov 6   ;;  %vm157_vm0 = vcmask 72704   ;;  %vm159_vm1 = vcmask 596992   ;;  %s6021_s23 = smov 126  }
  0x16   : > { %s141_s27 = scalar_lea.vmem %s6766_s0, %s5423_s24  ;;  %v5392_v34 = vld [vmem:[%s6767_s1 + $0x10] sm:$0xf]  ;;  %v6019_v36 = vmov 0.0   ;;  %v5397_v37 = vld [vmem:[%s6767_s1 + $0x38] sm:$0xf]  ;;  %vm6020_vm2 = vmmov 0  }
  0x17   : > { %v6100_v3 = vld [vmem:[%s141_s27 + $0x8] sm:$0xf]  ;;  %v6102_v4 = vld [vmem:[%s141_s27 + $0x4] sm:$0xf]  ;;  %v6109_v6 = vld [vmem:[%s141_s27 + $0xc] sm:$0xf]  ;;  %5544 = vmatprep.subr.mxu0 %v6019_v36  ;;  %5546 = vmatprep.mubr.msk.f32.mxu0 %vm6020_vm2, %v6019_v36 }
  0x18   : > { %168 = vrot.lane.b32.xlu0 %v6100_v3, %s6009_s28  ;;  %v6111_v7 = vld [vmem:[%s141_s27] sm:$0xf]  ;;  %5549 = vmatprep.subr.mxu1 %v6019_v36  ;;  %v6161_v42 = vand.u32 127, %v150_v41  ;;  %v5393_v61 = vld [vmem:[%s6767_s1 + $0x18] sm:$0xf]  ;;  %vm297_vm6 = vcmask 31744  }
  0x19   : > { %5905 = vset.pattern.permute.xlu1 %v6008_v5  ;;  %5551 = vmatprep.mubr.msk.f32.mxu1 %vm6020_vm2, %v6019_v36  ;;  %v5398_v38 = vld [vmem:[%s6767_s1 + $0x40] sm:$0xf]  ;;  %vm301_vm7 = vcmask 1043456   ;;  %vm2724_vm8 = vcmask 519168   ;;  %vm3191_vm9 = vcmask 7168   ;;  %vm3195_vm10 = vcmask 1040384  }
  0x1a   : > { %162 = vrot.lane.b32.xlu1 %v6102_v4, %s6009_s28  ;;  %v152_v45 = vand.u32 7, %v6161_v42  ;;  %vm179_vm3 = vcmp.ge.s32.totalorder %v6161_v42, 8  ;;  %vm4199_vm13 = vcmp.lt.s32.totalorder %v6161_v42, 56  ;;  %v5415_v42 = vld [vmem:[%s6767_s1 + $0xc8] sm:$0xff] }
  0x1c   : > { %174 = vrot.lane.b32.xlu0 %v6109_v6, %s6009_s28  ;;  %vm6167_vm4 = vcmp.ge.s32.totalorder %v152_v45, 1  ;;  %vm6615_vm11 = vcmp.le.s32.totalorder %v152_v45, 6 }
  0x1d   : > { %vm6177_vm5 = vmand %vm179_vm3, %vm6167_vm4 }
  0x1e   : > { %154 = vrot.lane.b32.xlu1 %v6111_v7, %s6009_s28  ;;  %vm6625_vm12 = vmand %vm179_vm3, %vm6615_vm11 }
  0x1f   : > { %vm6642_vm14 = vmand %vm4199_vm13, %vm6167_vm4 }
  0x20   : > { %240 = vperm.xlu0 %5904, %v149_v0   ;;  %vm6657_vm15 = vmand %vm4199_vm13, %vm6615_vm11 }
  0x22   : > { %260 = vperm.xlu1 %5905, %v149_v0  }
  0x24   : > { %5906 = vset.pattern.permute.xlu0 %v6010_v8 }
  0x25   : > { %270 = vperm.xlu0 %5906, %v149_v0  }
  0x26   : > { %5907 = vset.pattern.permute.xlu1 %v6011_v9 }
  0x27   : > { %187 = vperm.xlu1 %5907, %v149_v0  }
  0x29   : > { %5909 = vset.pattern.permute.xlu0 %v6013_v11 }
  0x2a   : > { %211 = vperm.xlu0 %5909, %v149_v0  }
  0x2b   : > { %5908 = vset.pattern.permute.xlu1 %v6012_v10 }
  0x2c   : > { %200 = vperm.xlu1 %5908, %v149_v0  }
  0x2e   : > { %5911 = vset.pattern.permute.xlu0 %v6015_v13 }
  0x30   : > { %5910 = vset.pattern.permute.xlu1 %v6014_v12 }
  0x31   : > { %224 = vperm.xlu1 %5910, %v149_v0  }
  0x35   : > { %5912 = vset.pattern.permute.xlu1 %v6011_v9 }
  0x8a   : > { %v169_v14 = vpop.permute.xlu0 %168 }
  0x8b   : > { %v171_v15 = vsel %vm157_vm0, 0.0, %v169_v14  ;;  %v299_v14 = vsel %vm297_vm6, %v5393_v61, 0  ;;  %v1689_v61 = vsel %vm301_vm7, %v6100_v3, 0 }
  0x8c   : > { %v172_v16 = vsel %vm159_vm1, %v171_v15, 0.0 }
  0x8d   : > { %195 = vrot.lane.b32.xlu1 %v172_v16, %s6016_s29 }
  0x8e   : > { %v175_v18 = vpop.permute.xlu0 %174 }
  0x8f   : > { %v177_v19 = vsel %vm157_vm0, 0.0, %v175_v18 }
  0x90   : > { %v231_v17 = vpop.permute.xlu1 %230  ;;  %v178_v20 = vsel %vm159_vm1, %v177_v19, 0.0 }
  0x91   : > { %206 = vrot.lane.b32.xlu0 %v178_v20, %s6016_s29  ;;  %v184_v54 = vsel %vm6177_vm5, %v178_v20, 0.0 }
  0x94   : > { %v163_v21 = vpop.permute.xlu1 %162 }
  0x95   : > { %v165_v22 = vsel %vm157_vm0, 0.0, %v163_v21  ;;  %254 = vperm.xlu0 %5911, %v149_v0  }
  0x96   : > { %v166_v23 = vsel %vm159_vm1, %v165_v22, 0.0 }
  0x97   : > { %219 = vrot.lane.b32.xlu1 %v166_v23, %s6017_s30 }
  0x98   : > { %v155_v24 = vpop.permute.xlu1 %154 }
  0x99   : > { %v158_v25 = vsel %vm157_vm0, 0.0, %v155_v24  ;;  %5913 = vset.pattern.permute.xlu0 %v6011_v9 }
  0x9a   : > { %v160_v26 = vsel %vm159_vm1, %v158_v25, 0.0 }
  0x9b   : > { %249 = vrot.lane.b32.xlu1 %v178_v20, %s6017_s30  ;;  %v233_v27 = vmul.f32 %v231_v17, %v160_v26  ;;  %v241_v28 = vpop.permute.xlu0 %240  ;;  %v6191_v17 = vand.u32 4294901760, %v299_v14 }
  0x9c   : > { %v243_v29 = vmul.f32 %v241_v28, %v166_v23 }
  0x9d   : > { %v261_v30 = vpop.permute.xlu1 %260  ;;  %v372_v23 = vsub.f32 %v299_v14, %v6191_v17 }
  0x9e   : > { %245 = vrot.lane.b32.xlu0 %v243_v29, %s6018_s3  ;;  %v263_v32 = vmul.f32 %v261_v30, %v172_v16 }
  0x9f   : > { %235 = vrot.lane.b32.xlu1 %v233_v27, %s6018_s3  ;;  %v373_v26 = vand.u32 4294901760, %v372_v23  ;;  %v5396_v27 = vld [vmem:[%s6767_s1 + $0x30] sm:$0xf] }
  0xa0   : > { %v271_v33 = vpop.permute.xlu0 %270 }
  0xa1   : > { %v273_v35 = vmul.f32 %v271_v33, %v178_v20  ;;  %v374_v33 = vsub.f32 %v372_v23, %v373_v26 }
  0xa2   : > { %265 = vrot.lane.b32.xlu0 %v263_v32, %s6018_s3  ;;  %v188_v39 = vpop.permute.xlu1 %187 }
  0xa3   : > { %285 = vperm.xlu1 %5912, %v5391_v31   ;;  %v190_v56 = vmul.f32 %v188_v39, %v184_v54  ;;  %v775_v31 = vsel %vm297_vm6, %v5396_v27, 0  ;;  %v1238_v54 = vsel %vm301_vm7, %v6102_v4, 0 }
  0xa5   : > { %v212_v44 = vpop.permute.xlu0 %211 }
  0xa6   : > { %275 = vrot.lane.b32.xlu0 %v273_v35, %s6018_s3  ;;  %v777_v35 = vsel %vm301_vm7, %v6111_v7, 0 }
  0xa7   : > { %291 = vperm.xlu1 %5912, %v5392_v34   ;;  %v201_v40 = vpop.permute.xlu1 %200  ;;  %v6205_v41 = vand.u32 4294901760, %v777_v35 }
  0xaa   : > { %1233 = vperm.xlu0 %5913, %v5398_v38   ;;  %v6202_v38 = vand.u32 4294901760, %v775_v31 }
  0xab   : > { %1227 = vperm.xlu1 %5912, %v5397_v37  }
  0xac   : > { %v225_v43 = vpop.permute.xlu1 %224 }
  0xae   : > { %5915 = vset.pattern.permute.xlu0 %v6007_v2 }
  0xaf   : > { %5914 = vset.pattern.permute.xlu1 %v6006_v1 }
  0xff   : > { %v196_v46 = vpop.permute.xlu1 %195 }
 0x100   : > { %v198_v49 = vsel %vm179_vm3, %v196_v46, 0.0 }
 0x101   : > { %v203_v53 = vmul.f32 %v201_v40, %v198_v49  ;;  %v375_v40 = vand.u32 4294901760, %v374_v33 }
 0x103   : > { %v207_v48 = vpop.permute.xlu0 %206  ;;  %v204_v59 = vadd.f32 %v203_v53, %v190_v56  ;;  %v6227_v56 = vand.u32 4294901760, %v1238_v54 }
 0x104   : > { %v209_v52 = vsel %vm179_vm3, %v207_v48, 0.0  ;;  %v887_v48 = vsub.f32 %v777_v35, %v6205_v41 }
 0x105   : > { %v214_v57 = vmul.f32 %v212_v44, %v209_v52  ;;  %v6208_v44 = vsub.f32 %v775_v31, %v6202_v38 }
 0x106   : > { %v888_v52 = vand.u32 4294901760, %v887_v48 }
 0x107   : > { %v215_v62 = vadd.f32 %v214_v57, %v204_v59  ;;  %v6216_v49 = vand.u32 4294901760, %v6208_v44 }
 0x108   : > { %v889_v57 = vsub.f32 %v887_v48, %v888_v52 }
 0x109   : > { %v220_v51 = vpop.permute.xlu1 %219 }
 0x10a   : > { %v222_v55 = vsel %vm6167_vm4, %v220_v51, 0.0  ;;  %v890_v59 = vand.u32 4294901760, %v889_v57 }
 0x10b   : > { %v227_v60 = vmul.f32 %v225_v43, %v222_v55  ;;  %v848_v55 = vsub.f32 %v6208_v44, %v6216_v49 }
 0x10d   : > { %v250_v58 = vpop.permute.xlu1 %249  ;;  %v228_v15 = vadd.f32 %v227_v60, %v215_v62  ;;  %v6233_v4 = vand.u32 4294901760, %v848_v55  ;;  %v6258_v62 = vand.u32 4294901760, %v1689_v61 }
 0x10e   : > { %v252_v18 = vsel %vm6167_vm4, %v250_v58, 0.0  ;;  %v1348_v58 = vsub.f32 %v1238_v54, %v6227_v56 }
 0x110   : > { %v255_v0 = vpop.permute.xlu0 %254  ;;  %v1349_v60 = vand.u32 4294901760, %v1348_v58 }
 0x111   : > { %v236_v63 = vpop.permute.xlu1 %235  ;;  %v257_v20 = vmul.f32 %v255_v0, %v252_v18 }
 0x112   : > { %v238_v16 = vadd.f32 %v236_v63, %v228_v15  ;;  %v1350_v3 = vsub.f32 %v1348_v58, %v1349_v60  ;;  %v1799_v63 = vsub.f32 %v1689_v61, %v6258_v62  ;;  %v2140_v15 = vsel %vm301_vm7, %v6109_v6, 0 }
 0x114   : > { %v246_v19 = vpop.permute.xlu0 %245  ;;  %v1351_v0 = vand.u32 4294901760, %v1350_v3  ;;  %v1800_v14 = vand.u32 4294901760, %v1799_v63 }
 0x115   : > { %v248_v21 = vadd.f32 %v246_v19, %v238_v16 }
 0x116   : > { %v1801_v16 = vsub.f32 %v1799_v63, %v1800_v14 }
 0x117   : > { %v258_v22 = vadd.f32 %v257_v20, %v248_v21 }
 0x118   : > { %v266_v24 = vpop.permute.xlu0 %265  ;;  %v1802_v18 = vand.u32 4294901760, %v1801_v16 }
 0x119   : > { %v268_v25 = vadd.f32 %v266_v24, %v258_v22  ;;  %v6359_v22 = vld [vmem:[%s6767_s1 + $0x48] sm:$0xf] }
 0x11a   : > { %2659 = vperm.xlu1 %5914, %v6359_v22  }
 0x11c   : > { %v276_v28 = vpop.permute.xlu0 %275 }
 0x11d   : > { %v278_v30 = vadd.f32 %v276_v28, %v268_v25 }
 0x11e   : > { %v286_v29 = vpop.permute.xlu1 %285  ;;  %5916 = vset.pattern.permute.xlu1 %v6008_v5 }
 0x11f   : > { %v288_v32 = vmul.f32 %v286_v29, %v278_v30 }
 0x122   : > { %v292_v34 = vpop.permute.xlu1 %291 }
 0x123   : > { %v294_v37 = vadd.f32 %v292_v34, %v288_v32 }
 0x125   : > { %v303_v39 = vsel %vm301_vm7, %v294_v37, 0 }
 0x126   : > { %v336_v43 = vand.u32 4294901760, %v303_v39 }
 0x128   : > { %v413_v46 = vsub.f32 %v303_v39, %v336_v43  ;;  %5545 = vmatpush3.msra.mxu0 %v336_v43 }
 0x129   : > { %5547 = vmatmul.mubr.f32.vlgmr.msra.gmra.mxu0 %v375_v40  ;;  %5554 = vmatprep.subr.mxu0 %v6019_v36 }
 0x12a   : > { %5555 = vmatpush3.msra.mxu0 %v413_v46  ;;  %5556 = vmatprep.mubr.msk.f32.mxu0 %vm6020_vm2, %v6019_v36  ;;  %v414_v7 = vand.u32 4294901760, %v413_v46 }
 0x12b   : > { %5564 = vmatprep.subr.mxu0 %v6019_v36 }
 0x12c   : > { %v415_v51 = vsub.f32 %v413_v46, %v414_v7 }
 0x12d   : > { %5557 = vmatmul.mubr.f32.vlgmr.msra.gmra.mxu0 %v372_v23 }
 0x12e   : > { %5565 = vmatpush3.msra.mxu0 %v414_v7  ;;  %v416_v53 = vand.u32 4294901760, %v415_v51  ;;  %5566 = vmatprep.mubr.msk.f32.mxu0 %vm6020_vm2, %v6019_v36 }
 0x12f   : > { %5574 = vmatprep.subr.mxu0 %v6019_v36 }
 0x130   : > { %5550 = vmatpush3.msra.mxu1 %v416_v53 }
 0x131   : > { %5552 = vmatmul.mubr.f32.vlgmr.msra.gmra.mxu1 %v6191_v17  ;;  %5559 = vmatprep.subr.mxu1 %v6019_v36 }
 0x132   : > { %5560 = vmatpush3.msra.mxu1 %v336_v43  ;;  %5561 = vmatprep.mubr.msk.f32.mxu1 %vm6020_vm2, %v6019_v36 }
 0x133   : > { %5569 = vmatprep.subr.mxu1 %v6019_v36  ;;  %5567 = vmatmul.mubr.f32.vlgmr.msra.gmra.mxu0 %v6191_v17 }
 0x134   : > { %5575 = vmatpush3.msra.mxu0 %v6205_v41  ;;  %5576 = vmatprep.mubr.msk.f32.mxu0 %vm6020_vm2, %v6019_v36 }
 0x135   : > { %5562 = vmatmul.mubr.f32.vlgmr.msra.gmra.mxu1 %v373_v26  ;;  %5584 = vmatprep.subr.mxu0 %v6019_v36 }
 0x136   : > { %5570 = vmatpush3.msra.mxu1 %v336_v43  ;;  %5571 = vmatprep.mubr.msk.f32.mxu1 %vm6020_vm2, %v6019_v36 }
 0x137   : > { %5577 = vmatmul.mubr.f32.vlgmr.msra.gmra.mxu0 %v6233_v4  ;;  %5579 = vmatprep.subr.mxu1 %v6019_v36 }
 0x138   : > { %5585 = vmatpush3.msra.mxu0 %v887_v48  ;;  %5586 = vmatprep.mubr.msk.f32.mxu0 %vm6020_vm2, %v6019_v36 }
 0x139   : > { %5572 = vmatmul.mubr.f32.vlgmr.msra.gmra.mxu1 %v6191_v17  ;;  %5594 = vmatprep.subr.mxu0 %v6019_v36  ;;  %v2173_v17 = vand.u32 4294901760, %v2140_v15 }
 0x13a   : > { %5580 = vmatpush3.msra.mxu1 %v890_v59  ;;  %5581 = vmatprep.mubr.msk.f32.mxu1 %vm6020_vm2, %v6019_v36 }
 0x13b   : > { %5587 = vmatmul.mubr.f32.vlgmr.msra.gmra.mxu0 %v6208_v44  ;;  %5589 = vmatprep.subr.mxu1 %v6019_v36  ;;  %v2250_v6 = vsub.f32 %v2140_v15, %v2173_v17 }
 0x13c   : > { %5595 = vmatpush3.msra.mxu0 %v888_v52  ;;  %5596 = vmatprep.mubr.msk.f32.mxu0 %vm6020_vm2, %v6019_v36 }
 0x13d   : > { %5582 = vmatmul.mubr.f32.vlgmr.msra.gmra.mxu1 %v6202_v38  ;;  %5604 = vmatprep.subr.mxu0 %v6019_v36  ;;  %v2251_v19 = vand.u32 4294901760, %v2250_v6 }
 0x13e   : > { %5590 = vmatpush3.msra.mxu1 %v6205_v41  ;;  %5591 = vmatprep.mubr.msk.f32.mxu1 %vm6020_vm2, %v6019_v36 }
 0x13f   : > { %5597 = vmatmul.mubr.f32.vlgmr.msra.gmra.mxu0 %v6202_v38  ;;  %5599 = vmatprep.subr.mxu1 %v6019_v36  ;;  %v2252_v20 = vsub.f32 %v2250_v6, %v2251_v19 }
 0x140   : > { %5605 = vmatpush3.msra.mxu0 %v6227_v56  ;;  %5606 = vmatprep.mubr.msk.f32.mxu0 %vm6020_vm2, %v6019_v36 }
 0x141   : > { %5592 = vmatmul.mubr.f32.vlgmr.msra.gmra.mxu1 %v6216_v49  ;;  %5614 = vmatprep.subr.mxu0 %v6019_v36  ;;  %v2253_v21 = vand.u32 4294901760, %v2252_v20 }
 0x142   : > { %5600 = vmatpush3.msra.mxu1 %v6205_v41  ;;  %5601 = vmatprep.mubr.msk.f32.mxu1 %vm6020_vm2, %v6019_v36 }
 0x143   : > { %5607 = vmatmul.mubr.f32.vlgmr.msra.gmra.mxu0 %v6233_v4  ;;  %5609 = vmatprep.subr.mxu1 %v6019_v36 }
 0x144   : > { %5615 = vmatpush3.msra.mxu0 %v1348_v58  ;;  %5616 = vmatprep.mubr.msk.f32.mxu0 %vm6020_vm2, %v6019_v36 }
 0x145   : > { %5602 = vmatmul.mubr.f32.vlgmr.msra.gmra.mxu1 %v6202_v38  ;;  %5624 = vmatprep.subr.mxu0 %v6019_v36 }
 0x146   : > { %5610 = vmatpush3.msra.mxu1 %v1351_v0  ;;  %5611 = vmatprep.mubr.msk.f32.mxu1 %vm6020_vm2, %v6019_v36 }
 0x147   : > { %5617 = vmatmul.mubr.f32.vlgmr.msra.gmra.mxu0 %v6208_v44  ;;  %5619 = vmatprep.subr.mxu1 %v6019_v36 }
 0x148   : > { %5625 = vmatpush3.msra.mxu0 %v1349_v60  ;;  %5626 = vmatprep.mubr.msk.f32.mxu0 %vm6020_vm2, %v6019_v36 }
 0x149   : > { %5612 = vmatmul.mubr.f32.vlgmr.msra.gmra.mxu1 %v6202_v38  ;;  %5634 = vmatprep.subr.mxu0 %v6019_v36 }
 0x14a   : > { %5620 = vmatpush3.msra.mxu1 %v6227_v56  ;;  %5621 = vmatprep.mubr.msk.f32.mxu1 %vm6020_vm2, %v6019_v36 }
 0x14b   : > { %5627 = vmatmul.mubr.f32.vlgmr.msra.gmra.mxu0 %v6202_v38  ;;  %5629 = vmatprep.subr.mxu1 %v6019_v36 }
 0x14c   : > { %5635 = vmatpush3.msra.mxu0 %v6258_v62  ;;  %5636 = vmatprep.mubr.msk.f32.mxu0 %vm6020_vm2, %v6019_v36 }
 0x14d   : > { %5622 = vmatmul.mubr.f32.vlgmr.msra.gmra.mxu1 %v6216_v49  ;;  %5644 = vmatprep.subr.mxu0 %v6019_v36 }
 0x14e   : > { %5630 = vmatpush3.msra.mxu1 %v6227_v56  ;;  %5631 = vmatprep.mubr.msk.f32.mxu1 %vm6020_vm2, %v6019_v36 }
 0x14f   : > { %5637 = vmatmul.mubr.f32.vlgmr.msra.gmra.mxu0 %v6233_v4  ;;  %5639 = vmatprep.subr.mxu1 %v6019_v36 }
 0x150   : > { %5645 = vmatpush3.msra.mxu0 %v1799_v63  ;;  %5646 = vmatprep.mubr.msk.f32.mxu0 %vm6020_vm2, %v6019_v36 }
 0x151   : > { %5632 = vmatmul.mubr.f32.vlgmr.msra.gmra.mxu1 %v6202_v38  ;;  %5654 = vmatprep.subr.mxu0 %v6019_v36 }
 0x152   : > { %5640 = vmatpush3.msra.mxu1 %v1802_v18  ;;  %5641 = vmatprep.mubr.msk.f32.mxu1 %vm6020_vm2, %v6019_v36 }
 0x153   : > { %5647 = vmatmul.mubr.f32.vlgmr.msra.gmra.mxu0 %v6208_v44  ;;  %5649 = vmatprep.subr.mxu1 %v6019_v36 }
 0x154   : > { %5655 = vmatpush3.msra.mxu0 %v1800_v14  ;;  %5656 = vmatprep.mubr.msk.f32.mxu0 %vm6020_vm2, %v6019_v36 }
 0x155   : > { %5642 = vmatmul.mubr.f32.vlgmr.msra.gmra.mxu1 %v6202_v38  ;;  %5664 = vmatprep.subr.mxu0 %v6019_v36 }
 0x156   : > { %5650 = vmatpush3.msra.mxu1 %v6258_v62  ;;  %5651 = vmatprep.mubr.msk.f32.mxu1 %vm6020_vm2, %v6019_v36 }
 0x157   : > { %5657 = vmatmul.mubr.f32.vlgmr.msra.gmra.mxu0 %v6202_v38  ;;  %5659 = vmatprep.subr.mxu1 %v6019_v36 }
 0x158   : > { %5665 = vmatpush3.msra.mxu0 %v2173_v17  ;;  %5666 = vmatprep.mubr.msk.f32.mxu0 %vm6020_vm2, %v6019_v36 }
 0x159   : > { %5652 = vmatmul.mubr.f32.vlgmr.msra.gmra.mxu1 %v6216_v49  ;;  %5674 = vmatprep.subr.mxu0 %v6019_v36 }
 0x15a   : > { %5660 = vmatpush3.msra.mxu1 %v6258_v62  ;;  %5661 = vmatprep.mubr.msk.f32.mxu1 %vm6020_vm2, %v6019_v36 }
 0x15b   : > { %5667 = vmatmul.mubr.f32.vlgmr.msra.gmra.mxu0 %v6233_v4  ;;  %5669 = vmatprep.subr.mxu1 %v6019_v36 }
 0x15c   : > { %5675 = vmatpush3.msra.mxu0 %v2250_v6  ;;  %5676 = vmatprep.mubr.msk.f32.mxu0 %vm6020_vm2, %v6019_v36 }
 0x15d   : > { %5662 = vmatmul.mubr.f32.vlgmr.msra.gmra.mxu1 %v6202_v38  ;;  %5684 = vmatprep.subr.mxu0 %v6019_v36 }
 0x15e   : > { %5670 = vmatpush3.msra.mxu1 %v2253_v21  ;;  %5671 = vmatprep.mubr.msk.f32.mxu1 %vm6020_vm2, %v6019_v36 }
 0x15f   : > { %5677 = vmatmul.mubr.f32.vlgmr.msra.gmra.mxu0 %v6208_v44  ;;  %5679 = vmatprep.subr.mxu1 %v6019_v36 }
 0x160   : > { %5685 = vmatpush3.msra.mxu0 %v2251_v19  ;;  %5686 = vmatprep.mubr.msk.f32.mxu0 %vm6020_vm2, %v6019_v36  ;;  %v1228_v19 = vpop.permute.xlu1 %1227 }
 0x161   : > { %5672 = vmatmul.mubr.f32.vlgmr.msra.gmra.mxu1 %v6202_v38  ;;  %5694 = vmatprep.subr.mxu0 %v6019_v36 }
 0x162   : > { %5680 = vmatpush3.msra.mxu1 %v2173_v17  ;;  %5681 = vmatprep.mubr.msk.f32.mxu1 %vm6020_vm2, %v6019_v36 }
 0x163   : > { %5687 = vmatmul.mubr.f32.vlgmr.msra.gmra.mxu0 %v6202_v38  ;;  %5689 = vmatprep.subr.mxu1 %v6019_v36 }
 0x164   : > { %5696 = vmatprep.mubr.msk.f32.mxu0 %vm6020_vm2, %v6019_v36 }
 0x165   : > { %5682 = vmatmul.mubr.f32.vlgmr.msra.gmra.mxu1 %v6216_v49 }
 0x166   : > { %5690 = vmatpush3.msra.mxu1 %v2173_v17  ;;  %5691 = vmatprep.mubr.msk.f32.mxu1 %vm6020_vm2, %v6019_v36 }
 0x167   : > { %5699 = vmatprep.subr.mxu1 %v6019_v36 }
 0x169   : > { %5692 = vmatmul.mubr.f32.vlgmr.msra.gmra.mxu1 %v6202_v38 }
 0x16a   : > { %5701 = vmatprep.mubr.msk.f32.mxu1 %vm6020_vm2, %v6019_v36 }
 0x1e9   : > { %v377_v23 = vpop.f32.mrf.mxu0 }
 0x1eb   : > { %v5548_v24 = vpop.f32.mrf.mxu0 }
 0x1ec   : > { %v1234_v24 = vpop.permute.xlu0 %1233 }
 0x1ed   : > { %v527_v25 = vpop.f32.mrf.mxu0 }
 0x1ef   : > { %v5558_v26 = vpop.f32.mrf.mxu0 }
 0x1f1   : > { %v453_v27 = vpop.f32.mrf.mxu1 }
 0x1f2   : > { %v454_v28 = vadd.f32 %v453_v27, %v377_v23 }
 0x1f3   : > { %v5553_v29 = vpop.f32.mrf.mxu1  ;;  %v675_v30 = vpop.f32.mrf.mxu0 }
 0x1f4   : > { %v528_v31 = vadd.f32 %v527_v25, %v454_v28 }
 0x1f5   : > { %v601_v32 = vpop.f32.mrf.mxu1  ;;  %v5568_v33 = vpop.f32.mrf.mxu0 }
 0x1f6   : > { %v602_v34 = vadd.f32 %v601_v32, %v528_v31 }
 0x1f7   : > { %v5563_v35 = vpop.f32.mrf.mxu1  ;;  %v851_v37 = vpop.f32.mrf.mxu0 }
 0x1f8   : > { %v676_v38 = vadd.f32 %v675_v30, %v602_v34 }
 0x1f9   : > { %v747_v39 = vpop.f32.mrf.mxu1  ;;  %v5578_v40 = vpop.f32.mrf.mxu0 }
 0x1fa   : > { %v6363_v41 = vadd.f32 %v747_v39, %v676_v38 }
 0x1fb   : > { %v5573_v43 = vpop.f32.mrf.mxu1  ;;  %v1001_v44 = vpop.f32.mrf.mxu0 }
 0x1fd   : > { %v927_v46 = vpop.f32.mrf.mxu1  ;;  %v5588_v48 = vpop.f32.mrf.mxu0 }
 0x1fe   : > { %v928_v32 = vadd.f32 %v927_v46, %v851_v37 }
 0x1ff   : > { %v5583_v7 = vpop.f32.mrf.mxu1  ;;  %v1149_v49 = vpop.f32.mrf.mxu0 }
 0x200   : > { %v1002_v48 = vadd.f32 %v1001_v44, %v928_v32 }
 0x201   : > { %v1075_v51 = vpop.f32.mrf.mxu1  ;;  %v5598_v52 = vpop.f32.mrf.mxu0 }
 0x203   : > { %v5593_v53 = vpop.f32.mrf.mxu1  ;;  %v1312_v54 = vpop.f32.mrf.mxu0 }
 0x205   : > { %v6365_v55 = vpop.f32.mrf.mxu1  ;;  %v5608_v56 = vpop.f32.mrf.mxu0 }
 0x207   : > { %v5603_v57 = vpop.f32.mrf.mxu1  ;;  %v1462_v4 = vpop.f32.mrf.mxu0 }
 0x209   : > { %v1388_v58 = vpop.f32.mrf.mxu1  ;;  %v5618_v59 = vpop.f32.mrf.mxu0 }
 0x20a   : > { %v1389_v60 = vadd.f32 %v1388_v58, %v1312_v54 }
 0x20b   : > { %v5613_v61 = vpop.f32.mrf.mxu1  ;;  %v1610_v62 = vpop.f32.mrf.mxu0 }
 0x20c   : > { %v1463_v3 = vadd.f32 %v1462_v4, %v1389_v60  ;;  %v1076_v4 = vadd.f32 %v1075_v51, %v1002_v48 }
 0x20d   : > { %v1536_v63 = vpop.f32.mrf.mxu1  ;;  %v5628_v0 = vpop.f32.mrf.mxu0 }
 0x20e   : > { %v1537_v14 = vadd.f32 %v1536_v63, %v1463_v3  ;;  %v1150_v44 = vadd.f32 %v1149_v49, %v1076_v4 }
 0x20f   : > { %v5623_v15 = vpop.f32.mrf.mxu1  ;;  %v1763_v16 = vpop.f32.mrf.mxu0 }
 0x210   : > { %v1611_v17 = vadd.f32 %v1610_v62, %v1537_v14 }
 0x211   : > { %v1682_v6 = vpop.f32.mrf.mxu1  ;;  %v5638_v18 = vpop.f32.mrf.mxu0 }
 0x212   : > { %v1683_v20 = vadd.f32 %v1682_v6, %v1611_v17 }
 0x213   : > { %v5633_v21 = vpop.f32.mrf.mxu1  ;;  %v1913_v23 = vpop.f32.mrf.mxu0 }
 0x214   : > { %v1686_v25 = vmul.f32 %v1683_v20, %v1228_v19 }
 0x215   : > { %v1839_v26 = vpop.f32.mrf.mxu1  ;;  %v5648_v27 = vpop.f32.mrf.mxu0 }
 0x216   : > { %v1840_v28 = vadd.f32 %v1839_v26, %v1763_v16  ;;  %v1687_v29 = vadd.f32 %v1686_v25, %v1234_v24  ;;  %v1222_v16 = vadd.f32 %v6365_v55, %v1150_v44 }
 0x217   : > { %v5643_v30 = vpop.f32.mrf.mxu1  ;;  %v2061_v31 = vpop.f32.mrf.mxu0 }
 0x218   : > { %v1914_v33 = vadd.f32 %v1913_v23, %v1840_v28  ;;  %v1688_v34 = vmax.f32 %v1687_v29, 0.0  ;;  %v1230_v21 = vmul.f32 %v1228_v19, %v1222_v16  ;;  %v2660_v28 = vpop.permute.xlu1 %2659 }
 0x219   : > { %v1987_v35 = vpop.f32.mrf.mxu1  ;;  %v5658_v38 = vpop.f32.mrf.mxu0 }
 0x21a   : > { %v1988_v39 = vadd.f32 %v1987_v35, %v1914_v33  ;;  %2600 = vrot.lane.b32.xlu0 %v1688_v34, %s6009_s28  ;;  %v1236_v26 = vadd.f32 %v1234_v24, %v1230_v21 }
 0x21b   : > { %v5653_v40 = vpop.f32.mrf.mxu1  ;;  %v2214_v43 = vpop.f32.mrf.mxu0 }
 0x21c   : > { %v2062_v7 = vadd.f32 %v2061_v31, %v1988_v39  ;;  %v1237_v27 = vmax.f32 %v1236_v26, 0.0 }
 0x21d   : > { %v2133_v52 = vpop.f32.mrf.mxu1  ;;  %v5668_v53 = vpop.f32.mrf.mxu0 }
 0x21e   : > { %v2134_v54 = vadd.f32 %v2133_v52, %v2062_v7  ;;  %2669 = vperm.xlu0 %5915, %v6359_v22   ;;  %v5400_v7 = vld [vmem:[%s6767_s1 + $0x50] sm:$0xf] }
 0x21f   : > { %v5663_v56 = vpop.f32.mrf.mxu1  ;;  %v2364_v57 = vpop.f32.mrf.mxu0 }
 0x220   : > { %v2137_v37 = vmul.f32 %v2134_v54, %v1228_v19 }
 0x221   : > { %v2290_v46 = vpop.f32.mrf.mxu1  ;;  %v5678_v58 = vpop.f32.mrf.mxu0 }
 0x222   : > { %v2291_v59 = vadd.f32 %v2290_v46, %v2214_v43  ;;  %v2138_v60 = vadd.f32 %v2137_v37, %v1234_v24  ;;  %5917 = vset.pattern.permute.xlu0 %v6010_v8 }
 0x223   : > { %v5673_v61 = vpop.f32.mrf.mxu1  ;;  %v2512_v62 = vpop.f32.mrf.mxu0  ;;  %2699 = vperm.xlu0 %5917, %v6359_v22  }
 0x224   : > { %v2365_v3 = vadd.f32 %v2364_v57, %v2291_v59  ;;  %v2139_v63 = vmax.f32 %v2138_v60, 0.0 }
 0x225   : > { %v2438_v0 = vpop.f32.mrf.mxu1  ;;  %v5688_v14 = vpop.f32.mrf.mxu0 }
 0x226   : > { %v2439_v15 = vadd.f32 %v2438_v0, %v2365_v3  ;;  %2606 = vrot.lane.b32.xlu1 %v2139_v63, %s6009_s28 }
 0x227   : > { %v5683_v51 = vpop.f32.mrf.mxu1  ;;  %5920 = vset.pattern.permute.xlu0 %v6013_v11 }
 0x228   : > { %v2513_v17 = vadd.f32 %v2512_v62, %v2439_v15  ;;  %2642 = vperm.xlu0 %5920, %v6359_v22  }
 0x229   : > { %v2584_v6 = vpop.f32.mrf.mxu1 }
 0x22a   : > { %v2585_v18 = vadd.f32 %v2584_v6, %v2513_v17 }
 0x22b   : > { %v5693_v20 = vpop.f32.mrf.mxu1 }
 0x22c   : > { %v2588_v49 = vmul.f32 %v2585_v18, %v1228_v19  ;;  %5922 = vset.pattern.permute.xlu0 %v6015_v13 }
 0x22e   : > { %v2589_v23 = vadd.f32 %v2588_v49, %v1234_v24 }
 0x230   : > { %v2590_v25 = vmax.f32 %v2589_v23, 0.0 }
 0x232   : > { %2612 = vrot.lane.b32.xlu1 %v2590_v25, %s6009_s28 }
 0x236   : > { %2594 = vrot.lane.b32.xlu1 %v1237_v27, %s6009_s28 }
 0x23a   : > { %2689 = vperm.xlu1 %5916, %v6359_v22  }
 0x23e   : > { %5918 = vset.pattern.permute.xlu1 %v6011_v9 }
 0x23f   : > { %2620 = vperm.xlu1 %5918, %v6359_v22  }
 0x243   : > { %5919 = vset.pattern.permute.xlu1 %v6012_v10 }
 0x244   : > { %2631 = vperm.xlu1 %5919, %v6359_v22  }
 0x248   : > { %5921 = vset.pattern.permute.xlu1 %v6014_v12 }
 0x249   : > { %2653 = vperm.xlu1 %5921, %v6359_v22  }
 0x24d   : > { %5923 = vset.pattern.permute.xlu1 %v6011_v9 }
 0x28c   : > { %v2601_v55 = vpop.permute.xlu0 %2600 }
 0x28d   : > { %v2603_v19 = vsel %vm157_vm0, 0.0, %v2601_v55 }
 0x28e   : > { %v2604_v24 = vsel %vm159_vm1, %v2603_v19, 0.0 }
 0x28f   : > { %2648 = vrot.lane.b32.xlu1 %v2604_v24, %s6017_s30 }
 0x298   : > { %v2607_v29 = vpop.permute.xlu1 %2606 }
 0x299   : > { %v2609_v30 = vsel %vm157_vm0, 0.0, %v2607_v29  ;;  %v2670_v39 = vpop.permute.xlu0 %2669 }
 0x29a   : > { %v2610_v31 = vsel %vm159_vm1, %v2609_v30, 0.0  ;;  %v2672_v48 = vmul.f32 %v2670_v39, %v2604_v24 }
 0x29b   : > { %2626 = vrot.lane.b32.xlu1 %v2610_v31, %s6016_s29 }
 0x29e   : > { %v2700_v54 = vpop.permute.xlu0 %2699 }
 0x2a3   : > { %v2643_v58 = vpop.permute.xlu0 %2642 }
 0x2a4   : > { %v2613_v32 = vpop.permute.xlu1 %2612 }
 0x2a5   : > { %v2615_v33 = vsel %vm157_vm0, 0.0, %v2613_v32 }
 0x2a6   : > { %v2616_v34 = vsel %vm159_vm1, %v2615_v33, 0.0 }
 0x2a7   : > { %2637 = vrot.lane.b32.xlu0 %v2616_v34, %s6016_s29  ;;  %v2702_v56 = vmul.f32 %v2700_v54, %v2616_v34  ;;  %v2617_v3 = vsel %vm6177_vm5, %v2616_v34, 0.0 }
 0x2a8   : > { %v2595_v35 = vpop.permute.xlu1 %2594 }
 0x2a9   : > { %v2597_v38 = vsel %vm157_vm0, 0.0, %v2595_v35 }
 0x2aa   : > { %v2598_v40 = vsel %vm159_vm1, %v2597_v38, 0.0 }
 0x2ab   : > { %v2662_v43 = vmul.f32 %v2660_v28, %v2598_v40  ;;  %2683 = vperm.xlu0 %5922, %v6359_v22   ;;  %v5401_v22 = vld [vmem:[%s6767_s1 + $0x58] sm:$0xf] }
 0x2ad   : > { %2664 = vrot.lane.b32.xlu1 %v2662_v43, %s6018_s3 }
 0x2af   : > { %2674 = vrot.lane.b32.xlu0 %v2672_v48, %s6018_s3 }
 0x2b0   : > { %5924 = vset.pattern.permute.xlu0 %v6011_v9 }
 0x2b1   : > { %2678 = vrot.lane.b32.xlu1 %v2616_v34, %s6017_s30  ;;  %v5402_v34 = vld [vmem:[%s6767_s1 + $0x60] sm:$0x1] }
 0x2b2   : > { %v2735_v35 = vsel %vm297_vm6, %v5402_v34, 0 }
 0x2b3   : > { %v2806_v38 = vand.u32 4294901760, %v2735_v35 }
 0x2b5   : > { %2714 = vperm.xlu1 %5923, %v5400_v7   ;;  %v2690_v52 = vpop.permute.xlu1 %2689  ;;  %v2807_v39 = vsub.f32 %v2735_v35, %v2806_v38  ;;  %v5405_v35 = vld [vmem:[%s6767_s1 + $0x78] sm:$0xf] }
 0x2b6   : > { %v2692_v53 = vmul.f32 %v2690_v52, %v2610_v31 }
 0x2b7   : > { %v2808_v40 = vand.u32 4294901760, %v2807_v39 }
 0x2b8   : > { %2694 = vrot.lane.b32.xlu0 %v2692_v53, %s6018_s3 }
 0x2b9   : > { %2720 = vperm.xlu1 %5923, %v5401_v22   ;;  %v2809_v43 = vsub.f32 %v2807_v39, %v2808_v40 }
 0x2ba   : > { %v2621_v57 = vpop.permute.xlu1 %2620 }
 0x2bb   : > { %v2623_v63 = vmul.f32 %v2621_v57, %v2617_v3  ;;  %v2810_v53 = vand.u32 4294901760, %v2809_v43 }
 0x2bc   : > { %2704 = vrot.lane.b32.xlu0 %v2702_v56, %s6018_s3 }
 0x2bd   : > { %5926 = vset.pattern.permute.xlu1 %v6013_v11 }
 0x2bf   : > { %v2632_v4 = vpop.permute.xlu1 %2631 }
 0x2c4   : > { %v2654_v37 = vpop.permute.xlu1 %2653 }
 0x301   : > { %v2649_v46 = vpop.permute.xlu1 %2648 }
 0x302   : > { %v2651_v15 = vsel %vm6167_vm4, %v2649_v46, 0.0 }
 0x303   : > { %v2656_v17 = vmul.f32 %v2654_v37, %v2651_v15  ;;  %v5404_v37 = vld [vmem:[%s6767_s1 + $0x70] sm:$0xf] }
 0x30d   : > { %v2627_v59 = vpop.permute.xlu1 %2626 }
 0x30e   : > { %v2629_v60 = vsel %vm179_vm3, %v2627_v59, 0.0 }
 0x30f   : > { %v2634_v44 = vmul.f32 %v2632_v4, %v2629_v60  ;;  %v3193_v60 = vsel %vm3191_vm9, %v5404_v37, 0 }
 0x311   : > { %v2635_v14 = vadd.f32 %v2634_v44, %v2623_v63  ;;  %v3265_v44 = vand.u32 4294901760, %v3193_v60 }
 0x319   : > { %v2638_v61 = vpop.permute.xlu0 %2637 }
 0x31a   : > { %v2640_v62 = vsel %vm179_vm3, %v2638_v61, 0.0 }
 0x31b   : > { %v2645_v0 = vmul.f32 %v2643_v58, %v2640_v62  ;;  %v5403_v58 = vld [vmem:[%s6767_s1 + $0x68] sm:$0x1] }
 0x31d   : > { %v2646_v51 = vadd.f32 %v2645_v0, %v2635_v14  ;;  %v3266_v14 = vsub.f32 %v3193_v60, %v3265_v44 }
 0x31f   : > { %v2665_v16 = vpop.permute.xlu1 %2664  ;;  %v2657_v6 = vadd.f32 %v2656_v17, %v2646_v51 }
 0x321   : > { %v2667_v21 = vadd.f32 %v2665_v16, %v2657_v6 }
 0x323   : > { %v2679_v20 = vpop.permute.xlu1 %2678 }
 0x324   : > { %v2681_v49 = vsel %vm6167_vm4, %v2679_v20, 0.0  ;;  %v3267_v20 = vand.u32 4294901760, %v3266_v14 }
 0x326   : > { %v2684_v18 = vpop.permute.xlu0 %2683 }
 0x327   : > { %v2686_v25 = vmul.f32 %v2684_v18, %v2681_v49 }
 0x32a   : > { %v2675_v23 = vpop.permute.xlu0 %2674 }
 0x32b   : > { %v2677_v26 = vadd.f32 %v2675_v23, %v2667_v21 }
 0x32d   : > { %v2687_v27 = vadd.f32 %v2686_v25, %v2677_v26  ;;  %v3268_v26 = vsub.f32 %v3266_v14, %v3267_v20 }
 0x32e   : > { %v2695_v55 = vpop.permute.xlu0 %2694 }
 0x32f   : > { %v2697_v24 = vadd.f32 %v2695_v55, %v2687_v27 }
 0x330   : > { %v2715_v19 = vpop.permute.xlu1 %2714 }
 0x332   : > { %v2705_v28 = vpop.permute.xlu0 %2704 }
 0x333   : > { %v2707_v29 = vadd.f32 %v2705_v28, %v2697_v24  ;;  %v3269_v24 = vand.u32 4294901760, %v3268_v26 }
 0x334   : > { %v2721_v31 = vpop.permute.xlu1 %2720 }
 0x335   : > { %v2717_v30 = vmul.f32 %v2715_v19, %v2707_v29 }
 0x337   : > { %v6421_v32 = vadd.f32 %v2721_v31, %v2717_v30 }
 0x339   : > { %v2725_v33 = vsel %vm2724_vm8, %v6421_v32, 0.0 }
 0x33a   : > { %2726 = vadd.xlane.f32.xlu1 %v2725_v33 }
 0x3c3   : > { %v2727_v48 = vpop.xlane.xlu1 %2726 }
 0x3c4   : > { %v2729_v7 = vmul.f32 0.015625, %v2727_v48 }
 0x3c6   : > { %v2738_v52 = vsel %vm301_vm7, %v2729_v7, 0 }
 0x3c7   : > { %v2771_v22 = vand.u32 4294901760, %v2738_v52 }
 0x3c9   : > { %v2848_v54 = vsub.f32 %v2738_v52, %v2771_v22  ;;  %5695 = vmatpush3.msra.mxu0 %v2771_v22 }
 0x3ca   : > { %5697 = vmatmul.mubr.f32.vlgmr.msra.gmra.mxu0 %v2810_v53  ;;  %5704 = vmatprep.subr.mxu0 %v6019_v36 }
 0x3cb   : > { %5705 = vmatpush3.msra.mxu0 %v2848_v54  ;;  %5706 = vmatprep.mubr.msk.f32.mxu0 %vm6020_vm2, %v6019_v36  ;;  %v2849_v56 = vand.u32 4294901760, %v2848_v54 }
 0x3cc   : > { %5714 = vmatprep.subr.mxu0 %v6019_v36 }
 0x3cd   : > { %v2850_v57 = vsub.f32 %v2848_v54, %v2849_v56 }
 0x3ce   : > { %5707 = vmatmul.mubr.f32.vlgmr.msra.gmra.mxu0 %v2807_v39 }
 0x3cf   : > { %5715 = vmatpush3.msra.mxu0 %v2849_v56  ;;  %v2851_v4 = vand.u32 4294901760, %v2850_v57  ;;  %5716 = vmatprep.mubr.msk.f32.mxu0 %vm6020_vm2, %v6019_v36 }
 0x3d0   : > { %5724 = vmatprep.subr.mxu0 %v6019_v36 }
 0x3d1   : > { %5700 = vmatpush3.msra.mxu1 %v2851_v4 }
 0x3d2   : > { %5702 = vmatmul.mubr.f32.vlgmr.msra.gmra.mxu1 %v2806_v38  ;;  %5709 = vmatprep.subr.mxu1 %v6019_v36 }
 0x3d3   : > { %5710 = vmatpush3.msra.mxu1 %v2771_v22  ;;  %5711 = vmatprep.mubr.msk.f32.mxu1 %vm6020_vm2, %v6019_v36 }
 0x3d4   : > { %5719 = vmatprep.subr.mxu1 %v6019_v36  ;;  %5717 = vmatmul.mubr.f32.vlgmr.msra.gmra.mxu0 %v2806_v38 }
 0x3d5   : > { %5726 = vmatprep.mubr.msk.f32.mxu0 %vm6020_vm2, %v6019_v36 }
 0x3d6   : > { %5712 = vmatmul.mubr.f32.vlgmr.msra.gmra.mxu1 %v2808_v40 }
 0x3d7   : > { %5720 = vmatpush3.msra.mxu1 %v2771_v22  ;;  %5721 = vmatprep.mubr.msk.f32.mxu1 %vm6020_vm2, %v6019_v36 }
 0x3d8   : > { %5729 = vmatprep.subr.mxu1 %v6019_v36 }
 0x3da   : > { %5722 = vmatmul.mubr.f32.vlgmr.msra.gmra.mxu1 %v2806_v38 }
 0x3db   : > { %5731 = vmatprep.mubr.msk.f32.mxu1 %vm6020_vm2, %v6019_v36 }
 0x48a   : > { %v2812_v46 = vpop.f32.mrf.mxu0 }
 0x48b   : > { %v2813_v62 = vadd.f32 %v5403_v58, %v2812_v46 }
 0x48c   : > { %v5698_v59 = vpop.f32.mrf.mxu0 }
 0x48e   : > { %v2962_v61 = vpop.f32.mrf.mxu0 }
 0x490   : > { %v5708_v3 = vpop.f32.mrf.mxu0 }
 0x491   : > { %v5407_v3 = vld [vmem:[%s6767_s1 + $0x88] sm:$0xf] }
 0x492   : > { %v2888_v63 = vpop.f32.mrf.mxu1 }
 0x493   : > { %v2889_v0 = vadd.f32 %v2888_v63, %v2813_v62  ;;  %v5408_v63 = vld [vmem:[%s6767_s1 + $0x90] sm:$0xf] }
 0x494   : > { %v5703_v15 = vpop.f32.mrf.mxu1  ;;  %v3110_v51 = vpop.f32.mrf.mxu0 }
 0x495   : > { %v2963_v16 = vadd.f32 %v2962_v61, %v2889_v0  ;;  %v5394_v0 = vld [vmem:[%s6767_s1 + $0x20] sm:$0xf]  ;;  %v6489_v15 = vld [vmem:[%s6767_s1 + $0xb0] sm:$0xf] }
 0x496   : > { %v3036_v17 = vpop.f32.mrf.mxu1  ;;  %v5718_v6 = vpop.f32.mrf.mxu0 }
 0x497   : > { %v3037_v18 = vadd.f32 %v3036_v17, %v2963_v16 }
 0x498   : > { %v5713_v21 = vpop.f32.mrf.mxu1 }
 0x499   : > { %v3111_v49 = vadd.f32 %v3110_v51, %v3037_v18  ;;  %v5406_v51 = vld [vmem:[%s6767_s1 + $0x80] sm:$0xf] }
 0x49a   : > { %v3182_v23 = vpop.f32.mrf.mxu1  ;;  %v3658_v16 = vsel %vm297_vm6, %v5406_v51, 0  ;;  %v5417_v51 = vld [vmem:[%s6767_s1 + $0xd8] sm:$0xff] }
 0x49b   : > { %v3183_v25 = vadd.f32 %v3182_v23, %v3111_v49  ;;  %v3729_v17 = vand.u32 4294901760, %v3658_v16 }
 0x49c   : > { %v5723_v27 = vpop.f32.mrf.mxu1 }
 0x49d   : > { %v3186_v55 = vmax.f32 %v3183_v25, 0.0  ;;  %v3730_v6 = vsub.f32 %v3658_v16, %v3729_v17 }
 0x49f   : > { %v3197_v19 = vsel %vm3195_vm10, %v3186_v55, 0  ;;  %v3731_v18 = vand.u32 4294901760, %v3730_v6 }
 0x4a0   : > { %v3230_v28 = vand.u32 4294901760, %v3197_v19 }
 0x4a2   : > { %v3307_v29 = vsub.f32 %v3197_v19, %v3230_v28  ;;  %5725 = vmatpush3.msra.mxu0 %v3230_v28 }
 0x4a3   : > { %5727 = vmatmul.mubr.f32.vlgmr.msra.gmra.mxu0 %v3269_v24  ;;  %5734 = vmatprep.subr.mxu0 %v6019_v36 }
 0x4a4   : > { %5735 = vmatpush3.msra.mxu0 %v3307_v29  ;;  %5736 = vmatprep.mubr.msk.f32.mxu0 %vm6020_vm2, %v6019_v36  ;;  %v3308_v30 = vand.u32 4294901760, %v3307_v29 }
 0x4a5   : > { %5744 = vmatprep.subr.mxu0 %v6019_v36 }
 0x4a6   : > { %v3309_v31 = vsub.f32 %v3307_v29, %v3308_v30 }
 0x4a7   : > { %5737 = vmatmul.mubr.f32.vlgmr.msra.gmra.mxu0 %v3266_v14  ;;  %v5395_v14 = vld [vmem:[%s6767_s1 + $0x28] sm:$0xf] }
 0x4a8   : > { %5745 = vmatpush3.msra.mxu0 %v3308_v30  ;;  %v3310_v33 = vand.u32 4294901760, %v3309_v31  ;;  %5746 = vmatprep.mubr.msk.f32.mxu0 %vm6020_vm2, %v6019_v36 }
 0x4a9   : > { %5754 = vmatprep.subr.mxu0 %v6019_v36 }
 0x4aa   : > { %5730 = vmatpush3.msra.mxu1 %v3310_v33 }
 0x4ab   : > { %5732 = vmatmul.mubr.f32.vlgmr.msra.gmra.mxu1 %v3265_v44  ;;  %5739 = vmatprep.subr.mxu1 %v6019_v36 }
 0x4ac   : > { %5740 = vmatpush3.msra.mxu1 %v3230_v28  ;;  %5741 = vmatprep.mubr.msk.f32.mxu1 %vm6020_vm2, %v6019_v36 }
 0x4ad   : > { %5749 = vmatprep.subr.mxu1 %v6019_v36  ;;  %5747 = vmatmul.mubr.f32.vlgmr.msra.gmra.mxu0 %v3265_v44 }
 0x4ae   : > { %5756 = vmatprep.mubr.msk.f32.mxu0 %vm6020_vm2, %v6019_v36 }
 0x4af   : > { %5742 = vmatmul.mubr.f32.vlgmr.msra.gmra.mxu1 %v3267_v20  ;;  %v3732_v20 = vsub.f32 %v3730_v6, %v3731_v18 }
 0x4b0   : > { %5750 = vmatpush3.msra.mxu1 %v3230_v28  ;;  %5751 = vmatprep.mubr.msk.f32.mxu1 %vm6020_vm2, %v6019_v36 }
 0x4b1   : > { %5759 = vmatprep.subr.mxu1 %v6019_v36  ;;  %v3733_v25 = vand.u32 4294901760, %v3732_v20 }
 0x4b3   : > { %5752 = vmatmul.mubr.f32.vlgmr.msra.gmra.mxu1 %v3265_v44 }
 0x4b4   : > { %5761 = vmatprep.mubr.msk.f32.mxu1 %vm6020_vm2, %v6019_v36 }
 0x563   : > { %v3271_v34 = vpop.f32.mrf.mxu0 }
 0x564   : > { %v3272_v40 = vadd.f32 %v5405_v35, %v3271_v34 }
 0x565   : > { %v5728_v38 = vpop.f32.mrf.mxu0 }
 0x567   : > { %v3421_v39 = vpop.f32.mrf.mxu0 }
 0x569   : > { %v5738_v43 = vpop.f32.mrf.mxu0 }
 0x56b   : > { %v3347_v48 = vpop.f32.mrf.mxu1 }
 0x56c   : > { %v3348_v7 = vadd.f32 %v3347_v48, %v3272_v40 }
 0x56d   : > { %v5733_v52 = vpop.f32.mrf.mxu1  ;;  %v3569_v53 = vpop.f32.mrf.mxu0 }
 0x56e   : > { %v3422_v22 = vadd.f32 %v3421_v39, %v3348_v7 }
 0x56f   : > { %v3495_v54 = vpop.f32.mrf.mxu1  ;;  %v5748_v56 = vpop.f32.mrf.mxu0 }
 0x570   : > { %v3496_v57 = vadd.f32 %v3495_v54, %v3422_v22 }
 0x571   : > { %v5743_v4 = vpop.f32.mrf.mxu1 }
 0x572   : > { %v3570_v37 = vadd.f32 %v3569_v53, %v3496_v57 }
 0x573   : > { %v3641_v46 = vpop.f32.mrf.mxu1 }
 0x574   : > { %v3642_v58 = vadd.f32 %v3641_v46, %v3570_v37 }
 0x575   : > { %v5753_v59 = vpop.f32.mrf.mxu1 }
 0x576   : > { %v3645_v60 = vadd.f32 3.0, %v3642_v58 }
 0x578   : > { %v3646_v61 = vmax.f32 %v3645_v60, 0.0 }
 0x57a   : > { %v3647_v62 = vmin.f32 %v3646_v61, 6.0 }
 0x57c   : > { %v3648_v44 = vmul.f32 0.16666667, %v3647_v62 }
 0x57e   : > { %3651 = vperm.xlu0 %5924, %v3648_v44  }
 0x582   : > { %4115 = vperm.xlu0 %5924, %v5407_v3  }
 0x586   : > { %4121 = vperm.xlu0 %5924, %v5408_v63  }
 0x58a   : > { %757 = vperm.xlu0 %5924, %v5394_v0  }
 0x58e   : > { %763 = vperm.xlu0 %5924, %v5395_v14   ;;  %v5410_v14 = vld [vmem:[%s6767_s1 + $0xa0] sm:$0xf] }
 0x592   : > { %5925 = vset.pattern.permute.xlu0 %v6006_v1 }
 0x593   : > { %4307 = vperm.xlu0 %5925, %v6489_v15  }
 0x5f9   : > { %v3652_v21 = vpop.permute.xlu0 %3651 }
 0x5fa   : > { %v3654_v49 = vmul.f32 %v3652_v21, %v6421_v32 }
 0x5fc   : > { %v3661_v23 = vsel %vm301_vm7, %v3654_v49, 0 }
 0x5fd   : > { %v3694_v26 = vand.u32 4294901760, %v3661_v23  ;;  %v6499_v1 = vpop.permute.xlu0 %4115 }
 0x5ff   : > { %v3771_v27 = vsub.f32 %v3661_v23, %v3694_v26  ;;  %5755 = vmatpush3.msra.mxu0 %v3694_v26 }
 0x600   : > { %5757 = vmatmul.mubr.f32.vlgmr.msra.gmra.mxu0 %v3733_v25  ;;  %5764 = vmatprep.subr.mxu0 %v6019_v36 }
 0x601   : > { %5765 = vmatpush3.msra.mxu0 %v3771_v27  ;;  %v6502_v55 = vpop.permute.xlu0 %4121  ;;  %5766 = vmatprep.mubr.msk.f32.mxu0 %vm6020_vm2, %v6019_v36  ;;  %v3772_v19 = vand.u32 4294901760, %v3771_v27 }
 0x602   : > { %5774 = vmatprep.subr.mxu0 %v6019_v36 }
 0x603   : > { %v3773_v32 = vsub.f32 %v3771_v27, %v3772_v19 }
 0x604   : > { %5767 = vmatmul.mubr.f32.vlgmr.msra.gmra.mxu0 %v3730_v6 }
 0x605   : > { %5775 = vmatpush3.msra.mxu0 %v3772_v19  ;;  %v758_v24 = vpop.permute.xlu0 %757  ;;  %v3774_v28 = vand.u32 4294901760, %v3773_v32  ;;  %5776 = vmatprep.mubr.msk.f32.mxu0 %vm6020_vm2, %v6019_v36 }
 0x606   : > { %5784 = vmatprep.subr.mxu0 %v6019_v36  ;;  %v760_v29 = vmul.f32 %v758_v24, %v6363_v41  ;;  %v6529_v41 = vld [vmem:[%s6767_s1 + $0x98] sm:$0xf] }
 0x607   : > { %5760 = vmatpush3.msra.mxu1 %v3774_v28 }
 0x608   : > { %5762 = vmatmul.mubr.f32.vlgmr.msra.gmra.mxu1 %v3729_v17  ;;  %5769 = vmatprep.subr.mxu1 %v6019_v36 }
 0x609   : > { %5770 = vmatpush3.msra.mxu1 %v3694_v26  ;;  %v764_v30 = vpop.permute.xlu0 %763  ;;  %5771 = vmatprep.mubr.msk.f32.mxu1 %vm6020_vm2, %v6019_v36 }
 0x60a   : > { %v766_v31 = vadd.f32 %v764_v30, %v760_v29  ;;  %5779 = vmatprep.subr.mxu1 %v6019_v36  ;;  %5777 = vmatmul.mubr.f32.vlgmr.msra.gmra.mxu0 %v3729_v17 }
 0x60b   : > { %5786 = vmatprep.mubr.msk.f32.mxu0 %vm6020_vm2, %v6019_v36 }
 0x60c   : > { %v767_v33 = vmax.f32 %v766_v31, 0.0  ;;  %5772 = vmatmul.mubr.f32.vlgmr.msra.gmra.mxu1 %v3731_v18 }
 0x60d   : > { %5780 = vmatpush3.msra.mxu1 %v3694_v26  ;;  %5781 = vmatprep.mubr.msk.f32.mxu1 %vm6020_vm2, %v6019_v36 }
 0x60e   : > { %4129 = vrot.lane.b32.xlu1 %v767_v33, %s6009_s28  ;;  %5789 = vmatprep.subr.mxu1 %v6019_v36 }
 0x610   : > { %5782 = vmatmul.mubr.f32.vlgmr.msra.gmra.mxu1 %v3729_v17 }
 0x611   : > { %5791 = vmatprep.mubr.msk.f32.mxu1 %vm6020_vm2, %v6019_v36 }
 0x612   : > { %4291 = vperm.xlu1 %5926, %v6489_v15  }
 0x616   : > { %5930 = vset.pattern.permute.xlu1 %v6015_v13 }
 0x617   : > { %4331 = vperm.xlu1 %5930, %v6489_v15  }
 0x61b   : > { %5931 = vset.pattern.permute.xlu1 %v6011_v9 }
 0x61c   : > { %4137 = vperm.xlu1 %5931, %v6529_v41  }
 0x620   : > { %5933 = vset.pattern.permute.xlu1 %v6008_v5 }
 0x621   : > { %4341 = vperm.xlu1 %5933, %v6489_v15  }
 0x625   : > { %5934 = vset.pattern.permute.xlu1 %v6013_v11  ;;  %v5413_v11 = vld [vmem:[%s6767_s1 + $0xb8] sm:$0xf] }
 0x626   : > { %4162 = vperm.xlu1 %5934, %v6529_v41  }
 0x62a   : > { %5935 = vset.pattern.permute.xlu1 %v6010_v8 }
 0x62b   : > { %4351 = vperm.xlu1 %5935, %v6489_v15  }
 0x62f   : > { %5936 = vset.pattern.permute.xlu1 %v6014_v12 }
 0x630   : > { %4172 = vperm.xlu1 %5936, %v6529_v41  }
 0x634   : > { %5937 = vset.pattern.permute.xlu1 %v6011_v9 }
 0x680   : > { %v4130_v34 = vpop.permute.xlu1 %4129 }
 0x681   : > { %v4132_v35 = vsel %vm157_vm0, 0.0, %v4130_v34 }
 0x682   : > { %v6544_v38 = vsel %vm159_vm1, %v4132_v35, 0.0 }
 0x683   : > { %4157 = vrot.lane.b32.xlu1 %v6544_v38, %s6021_s23 }
 0x687   : > { %4362 = vperm.xlu1 %5937, %v5413_v11  }
 0x68b   : > { %5938 = vset.pattern.permute.xlu1 %v6007_v2 }
 0x68c   : > { %4194 = vperm.xlu1 %5938, %v6529_v41  }
 0x68d   : > { %v4292_v16 = vpop.permute.xlu1 %4291 }
 0x690   : > { %5939 = vset.pattern.permute.xlu1 %v6015_v13 }
 0x691   : > { %4208 = vperm.xlu1 %5939, %v6529_v41  }
 0x695   : > { %4189 = vrot.lane.b32.xlu1 %v6544_v38, %s6022_s26 }
 0x696   : > { %5943 = vset.pattern.permute.xlu1 %v6011_v9 }
 0x6c0   : > { %v3735_v39 = vpop.f32.mrf.mxu0 }
 0x6c2   : > { %v5758_v40 = vpop.f32.mrf.mxu0 }
 0x6c4   : > { %v3885_v43 = vpop.f32.mrf.mxu0 }
 0x6c6   : > { %v5768_v48 = vpop.f32.mrf.mxu0 }
 0x6c8   : > { %v3811_v7 = vpop.f32.mrf.mxu1 }
 0x6c9   : > { %v3812_v52 = vadd.f32 %v3811_v7, %v3735_v39 }
 0x6ca   : > { %v5763_v53 = vpop.f32.mrf.mxu1  ;;  %v4033_v22 = vpop.f32.mrf.mxu0 }
 0x6cb   : > { %v3886_v54 = vadd.f32 %v3885_v43, %v3812_v52 }
 0x6cc   : > { %v3959_v56 = vpop.f32.mrf.mxu1  ;;  %v5778_v57 = vpop.f32.mrf.mxu0 }
 0x6cd   : > { %v3960_v13 = vadd.f32 %v3959_v56, %v3886_v54 }
 0x6ce   : > { %v5773_v4 = vpop.f32.mrf.mxu1 }
 0x6cf   : > { %v4034_v37 = vadd.f32 %v4033_v22, %v3960_v13 }
 0x6d0   : > { %v4105_v46 = vpop.f32.mrf.mxu1 }
 0x6d1   : > { %v4106_v58 = vadd.f32 %v4105_v46, %v4034_v37 }
 0x6d2   : > { %v5783_v59 = vpop.f32.mrf.mxu1 }
 0x6d3   : > { %v4118_v60 = vmul.f32 %v6499_v1, %v4106_v58 }
 0x6d5   : > { %v4124_v61 = vadd.f32 %v6502_v55, %v4118_v60  ;;  %v4134_v60 = vsel %vm6177_vm5, %v6544_v38, 0.0 }
 0x6d7   : > { %v4125_v62 = vmax.f32 %v4124_v61, 0.0 }
 0x6d9   : > { %4262 = vrot.lane.b32.xlu0 %v4125_v62, %s6009_s28  ;;  %s5420_s28 = sshll.u32 %s6063_s13, 7 }
 0x6dd   : > { %4178 = vperm.xlu0 %5925, %v6529_v41  }
 0x6e1   : > { %5927 = vset.pattern.permute.xlu0 %v6014_v12 }
 0x6e2   : > { %4301 = vperm.xlu0 %5927, %v6489_v15  }
 0x6e6   : > { %5928 = vset.pattern.permute.xlu0 %v6007_v2  ;;  %v5414_v2 = vld [vmem:[%s6767_s1 + $0xc0] sm:$0xf] }
 0x6e7   : > { %4321 = vperm.xlu0 %5928, %v6489_v15  }
 0x6eb   : > { %5929 = vset.pattern.permute.xlu0 %v6012_v10  ;;  %v4308_v10 = vpop.permute.xlu0 %4307 }
 0x6ec   : > { %4281 = vperm.xlu0 %5929, %v6489_v15  }
 0x6f0   : > { %4148 = vperm.xlu0 %5929, %v6529_v41  }
 0x6f4   : > { %5932 = vset.pattern.permute.xlu0 %v6011_v9 }
 0x6f5   : > { %4270 = vperm.xlu0 %5932, %v6489_v15   ;;  %v5418_v15 = vld [vmem:[%s6767_s1 + $0xe0] sm:$0xff] }
 0x6f9   : > { %4143 = vrot.lane.b32.xlu0 %v6544_v38, %s6016_s29 }
 0x6fd   : > { %4167 = vrot.lane.b32.xlu0 %v6544_v38, %s6017_s30 }
 0x701   : > { %4368 = vperm.xlu0 %5932, %v5414_v2  }
 0x705   : > { %5940 = vset.pattern.permute.xlu0 %v6008_v5 }
 0x74b   : > { %v4263_v12 = vpop.permute.xlu0 %4262 }
 0x74c   : > { %v4265_v44 = vsel %vm157_vm0, 0.0, %v4263_v12  ;;  %vm5306_vm0 = vcmask 523264  }
 0x74d   : > { %v4266_v3 = vsel %vm159_vm1, %v4265_v44, 0.0 }
 0x74e   : > { %4326 = vrot.lane.b32.xlu0 %v4266_v3, %s6023_s4  ;;  %4276 = vrot.lane.b32.xlu1 %v4266_v3, %s6016_s29  ;;  %v4310_v63 = vmul.f32 %v4308_v10, %v4266_v3  ;;  %v4267_v45 = vsel %vm6177_vm5, %v4266_v3, 0.0  ;;  %s5320_s29 = scalar_lea.hbm %s6768_s2, %s5420_s28 }
 0x752   : > { %4336 = vrot.lane.b32.xlu0 %v4266_v3, %s6024_s5  ;;  %4286 = vrot.lane.b32.xlu1 %v4266_v3, %s6021_s23 }
 0x756   : > { %4346 = vrot.lane.b32.xlu0 %v4266_v3, %s6025_s6  ;;  %4296 = vrot.lane.b32.xlu1 %v4266_v3, %s6017_s30  ;;  %s5309_s30 = scalar_lea.sflag [#allocation3], %s134_s25 }
 0x758   : > { %v4179_v5 = vpop.permute.xlu0 %4178 }
 0x759   : > { %v4181_v0 = vmul.f32 %v4179_v5, %v6544_v38 }
 0x75a   : > { %4316 = vrot.lane.b32.xlu1 %v4266_v3, %s6022_s26  ;;  %4312 = vrot.lane.b32.xlu0 %v4310_v63, %s6018_s3  ;;  %s5385_s26 = sshll.u32 %s134_s25, 3 }
 0x75b   : > { %s136_s27 = scalar_lea.vmem [#allocation2], %s5385_s26 }
 0x75d   : > { %v4302_v20 = vpop.permute.xlu0 %4301 }
 0x75e   : > { %4220 = vperm.xlu0 %5940, %v6529_v41   ;;  %4183 = vrot.lane.b32.xlu1 %v4181_v0, %s6018_s3  ;;  %s5948_s3 = sshll.u32 %s6026_s8, 4  ;;  %s5949_s3 = int_to_ptr.vmem [resolvable:$false] %s5948_s3 }
 0x75f   : > { %s5950_s13 = scalar_lea.vmem %s5949_s3, 256 }
 0x762   : > { %5941 = vset.pattern.permute.xlu0 %v6010_v8  ;;  %4203 = vrot.lane.b32.xlu1 %v6544_v38, %s6023_s4  ;;  %v5411_v8 = vld [vmem:[%s6767_s1 + $0xa8] sm:$0xf]  ;;  %v4322_v49 = vpop.permute.xlu0 %4321  ;;  %s5322_s4 = sshll.u32 %s136_s27, 4  ;;  %s5323_s4 = int_to_ptr.vmem [resolvable:$true] %s5322_s4 }
 0x763   : > { %4233 = vperm.xlu0 %5941, %v6529_v41   ;;  %s5944_s7 = scalar_lea.vmem %s5323_s4, 128  ;;  %p5951_p0 = scmp.lt.s32.totalorder %s5323_s4, %s5949_s3 }
 0x764   : > { %p5945_p11 = scmp.ne.s32.totalorder %s5323_s4, %s5944_s7  ;;  %p5952_p1 = scmp.lt.s32.totalorder %s5950_s13, %s5944_s7 }
 0x766   : > { %4215 = vrot.lane.b32.xlu1 %v6544_v38, %s6024_s5  ;;  %p5946_p12 = pnand %p5945_p11, %p6080_p5  ;;  %p5953_p2 = por %p5952_p1, %p5951_p0 }
 0x767   : > { %5942 = vset.pattern.permute.xlu0 %v6011_v9  ;;  %v4332_v9 = vpop.permute.xlu1 %4331  ;;  %v4282_v25 = vpop.permute.xlu0 %4281 }
 0x768   : > { %4244 = vperm.xlu0 %5942, %v5410_v14   ;;  %v5416_v14 = vld [vmem:[%s6767_s1 + $0xd0] sm:$0xff]  ;;  %p5947_p13 = pneg %p5946_p12 }
 0x76a   : > { %4228 = vrot.lane.b32.xlu1 %v6544_v38, %s6025_s6  ;;  %p5954_p3 = pnand %p5953_p2, %p5947_p13 }
 0x76b   : > { %v4138_v17 = vpop.permute.xlu1 %4137  ;;  %v4149_v1 = vpop.permute.xlu0 %4148 }
 0x76c   : > { %5297 = vperm.xlu0 %5942, %v5418_v15   ;;  %v4140_v2 = vmul.f32 %v4138_v17, %v4134_v60 }
 0x76e   : > { %4250 = vperm.xlu1 %5943, %v5411_v8  }
 0x76f   : > { %v4342_v6 = vpop.permute.xlu1 %4341 }
 0x770   : > { %v4271_v55 = vpop.permute.xlu0 %4270 }
 0x771   : > { %v4273_v48 = vmul.f32 %v4271_v55, %v4267_v45 }
 0x772   : > { %5291 = vperm.xlu1 %5943, %v5417_v51  }
 0x773   : > { %v4163_v18 = vpop.permute.xlu1 %4162 }
 0x774   : > { %v4144_v32 = vpop.permute.xlu0 %4143 }
 0x775   : > { %v4146_v54 = vsel %vm179_vm3, %v4144_v32, 0.0 }
 0x776   : > { %v4151_v37 = vmul.f32 %v4149_v1, %v4146_v54  ;;  %v4834_v54 = vsel %vm297_vm6, %v5415_v42, 0 }
 0x777   : > { %v4352_v21 = vpop.permute.xlu1 %4351 }
 0x778   : > { %v4168_v28 = vpop.permute.xlu0 %4167  ;;  %v4152_v3 = vadd.f32 %v4151_v37, %v4140_v2 }
 0x779   : > { %v4170_v15 = vsel %vm6167_vm4, %v4168_v28, 0.0 }
 0x77b   : > { %v4173_v23 = vpop.permute.xlu1 %4172 }
 0x77c   : > { %v4369_v30 = vpop.permute.xlu0 %4368 }
 0x77f   : > { %v4158_v26 = vpop.permute.xlu1 %4157 }
 0x780   : > { %v4160_v50 = vsel %vm6625_vm12, %v4158_v26, 0.0 }
 0x781   : > { %v4165_v51 = vmul.f32 %v4163_v18, %v4160_v50 }
 0x783   : > { %v4363_v27 = vpop.permute.xlu1 %4362  ;;  %v4166_v26 = vadd.f32 %v4165_v51, %v4152_v3 }
 0x787   : > { %v6607_v19 = vpop.permute.xlu1 %4194 }
 0x78b   : > { %v6609_v24 = vpop.permute.xlu1 %4208 }
 0x78f   : > { %v6611_v29 = vpop.permute.xlu1 %4189 }
 0x790   : > { %v4192_v28 = vsel %vm6615_vm11, %v6611_v29, 0.0 }
 0x7c0   : > { %v4277_v31 = vpop.permute.xlu1 %4276  ;;  %v4327_v33 = vpop.permute.xlu0 %4326 }
 0x7c1   : > { %v4279_v34 = vsel %vm179_vm3, %v4277_v31, 0.0  ;;  %v4329_v61 = vsel %vm6642_vm14, %v4327_v33, 0.0 }
 0x7c2   : > { %v4284_v11 = vmul.f32 %v4282_v25, %v4279_v34  ;;  %v4334_v63 = vmul.f32 %v4332_v9, %v4329_v61 }
 0x7c4   : > { %v4287_v39 = vpop.permute.xlu1 %4286  ;;  %v4337_v40 = vpop.permute.xlu0 %4336  ;;  %v4285_v52 = vadd.f32 %v4284_v11, %v4273_v48  ;;  %v4197_v11 = vmul.f32 %v6607_v19, %v4192_v28 }
 0x7c5   : > { %v4289_v43 = vsel %vm6625_vm12, %v4287_v39, 0.0  ;;  %v4339_v38 = vsel %vm4199_vm13, %v4337_v40, 0.0 }
 0x7c6   : > { %v4294_v7 = vmul.f32 %v4292_v16, %v4289_v43  ;;  %v4344_v16 = vmul.f32 %v4342_v6, %v4339_v38 }
 0x7c8   : > { %v4297_v53 = vpop.permute.xlu1 %4296  ;;  %v4347_v22 = vpop.permute.xlu0 %4346  ;;  %v4295_v13 = vadd.f32 %v4294_v7, %v4285_v52 }
 0x7c9   : > { %v4299_v56 = vsel %vm6167_vm4, %v4297_v53, 0.0  ;;  %v4349_v8 = vsel %vm6657_vm15, %v4347_v22, 0.0 }
 0x7ca   : > { %v4304_v4 = vmul.f32 %v4302_v20, %v4299_v56  ;;  %v4382_v20 = vsel %vm297_vm6, %v5416_v14, 0  ;;  %v4354_v25 = vmul.f32 %v4352_v21, %v4349_v8 }
 0x7cb   : > { %v6673_v32 = vand.u32 4294901760, %v4382_v20 }
 0x7cc   : > { %v4317_v46 = vpop.permute.xlu1 %4316  ;;  %v4305_v58 = vadd.f32 %v4304_v4, %v4295_v13  ;;  %v4313_v59 = vpop.permute.xlu0 %4312 }
 0x7cd   : > { %v4319_v62 = vsel %vm6615_vm11, %v4317_v46, 0.0  ;;  %v4454_v21 = vsub.f32 %v4382_v20, %v6673_v32  ;;  %v6692_v46 = vand.u32 4294901760, %v4834_v54 }
 0x7ce   : > { %v4324_v12 = vmul.f32 %v4322_v49, %v4319_v62  ;;  %v4315_v44 = vadd.f32 %v4313_v59, %v4305_v58  ;;  %v4175_v49 = vmul.f32 %v4173_v23, %v4170_v15 }
 0x7cf   : > { %v4455_v7 = vand.u32 4294901760, %v4454_v21  ;;  %v4906_v2 = vsub.f32 %v4834_v54, %v6692_v46 }
 0x7d0   : > { %v4325_v5 = vadd.f32 %v4324_v12, %v4315_v44  ;;  %v4184_v0 = vpop.permute.xlu1 %4183  ;;  %v4176_v33 = vadd.f32 %v4175_v49, %v4166_v26 }
 0x7d1   : > { %v4907_v38 = vand.u32 4294901760, %v4906_v2 }
 0x7d2   : > { %v4335_v17 = vadd.f32 %v4334_v63, %v4325_v5  ;;  %v4186_v34 = vadd.f32 %v4184_v0, %v4176_v33 }
 0x7d3   : > { %v4908_v0 = vsub.f32 %v4906_v2, %v4907_v38 }
 0x7d4   : > { %v4345_v9 = vadd.f32 %v4344_v16, %v4335_v17  ;;  %v4204_v1 = vpop.permute.xlu1 %4203  ;;  %v4198_v41 = vadd.f32 %v4197_v11, %v4186_v34 }
 0x7d5   : > { %v4206_v6 = vsel %vm6642_vm14, %v4204_v1, 0.0  ;;  %v4909_v8 = vand.u32 4294901760, %v4908_v0 }
 0x7d6   : > { %v4355_v55 = vadd.f32 %v4354_v25, %v4345_v9 }
 0x7d8   : > { %v4365_v31 = vmul.f32 %v4363_v27, %v4355_v55  ;;  %v4216_v47 = vpop.permute.xlu1 %4215  ;;  %v4211_v27 = vmul.f32 %v6609_v24, %v4206_v6  ;;  %v4456_v24 = vsub.f32 %v4454_v21, %v4455_v7 }
 0x7d9   : > { %v4221_v18 = vpop.permute.xlu0 %4220  ;;  %v4218_v35 = vsel %vm4199_vm13, %v4216_v47, 0.0 }
 0x7da   : > { %v4371_v23 = vadd.f32 %v4369_v30, %v4365_v31  ;;  %v4223_v45 = vmul.f32 %v4221_v18, %v4218_v35  ;;  %v4212_v30 = vadd.f32 %v4211_v27, %v4198_v41  ;;  %v4457_v37 = vand.u32 4294901760, %v4456_v24 }
 0x7dc   : > { %v4229_v39 = vpop.permute.xlu1 %4228  ;;  %v4372_v40 = vadd.f32 3.0, %v4371_v23  ;;  %v4224_v19 = vadd.f32 %v4223_v45, %v4212_v30 }
 0x7dd   : > { %v4231_v29 = vsel %vm6657_vm15, %v4229_v39, 0.0 }
 0x7de   : > { %v4234_v43 = vpop.permute.xlu0 %4233  ;;  %v4373_v48 = vmax.f32 %v4372_v40, 0.0 }
 0x7df   : > { %v4236_v52 = vmul.f32 %v4234_v43, %v4231_v29 }
 0x7e0   : > { %v4374_v53 = vmin.f32 %v4373_v48, 6.0 }
 0x7e1   : > { %v4237_v56 = vadd.f32 %v4236_v52, %v4224_v19 }
 0x7e2   : > { %v4375_v22 = vmul.f32 0.16666667, %v4374_v53 }
 0x7e3   : > { %v4245_v13 = vpop.permute.xlu0 %4244 }
 0x7e4   : > { %v4376_v57 = vmul.f32 %v4375_v22, %v4371_v23  ;;  %v4247_v59 = vmul.f32 %v4245_v13, %v4237_v56 }
 0x7e6   : > { %v4385_v4 = vsel %vm301_vm7, %v4376_v57, 0 }
 0x7e7   : > { %v4418_v58 = vand.u32 4294901760, %v4385_v4  ;;  %v5298_v13 = vpop.permute.xlu0 %5297 }
 0x7e9   : > { %v4251_v60 = vpop.permute.xlu1 %4250  ;;  %5785 = vmatpush3.msra.mxu0 %v4418_v58  ;;  %v4495_v61 = vsub.f32 %v4385_v4, %v4418_v58 }
 0x7ea   : > { %v4253_v62 = vadd.f32 %v4251_v60, %v4247_v59  ;;  %5787 = vmatmul.mubr.f32.vlgmr.msra.gmra.mxu0 %v4457_v37  ;;  %5794 = vmatprep.subr.mxu0 %v6019_v36 }
 0x7eb   : > { %5795 = vmatpush3.msra.mxu0 %v4495_v61  ;;  %5796 = vmatprep.mubr.msk.f32.mxu0 %vm6020_vm2, %v6019_v36  ;;  %v4496_v10 = vand.u32 4294901760, %v4495_v61 }
 0x7ec   : > { %v4254_v12 = vadd.f32 3.0, %v4253_v62  ;;  %5804 = vmatprep.subr.mxu0 %v6019_v36 }
 0x7ed   : > { %v4497_v44 = vsub.f32 %v4495_v61, %v4496_v10  ;;  %v5292_v54 = vpop.permute.xlu1 %5291 }
 0x7ee   : > { %v4255_v50 = vmax.f32 %v4254_v12, 0.0  ;;  %5797 = vmatmul.mubr.f32.vlgmr.msra.gmra.mxu0 %v4454_v21 }
 0x7ef   : > { %5805 = vmatpush3.msra.mxu0 %v4496_v10  ;;  %v4498_v3 = vand.u32 4294901760, %v4497_v44  ;;  %5806 = vmatprep.mubr.msk.f32.mxu0 %vm6020_vm2, %v6019_v36 }
 0x7f0   : > { %v4256_v63 = vmin.f32 %v4255_v50, 6.0  ;;  %5814 = vmatprep.subr.mxu0 %v6019_v36 }
 0x7f1   : > { %5790 = vmatpush3.msra.mxu1 %v4498_v3 }
 0x7f2   : > { %v4257_v5 = vmul.f32 0.16666667, %v4256_v63  ;;  %5792 = vmatmul.mubr.f32.vlgmr.msra.gmra.mxu1 %v6673_v32  ;;  %5799 = vmatprep.subr.mxu1 %v6019_v36 }
 0x7f3   : > { %5800 = vmatpush3.msra.mxu1 %v4418_v58  ;;  %5801 = vmatprep.mubr.msk.f32.mxu1 %vm6020_vm2, %v6019_v36 }
 0x7f4   : > { %v4258_v14 = vmul.f32 %v4257_v5, %v4253_v62  ;;  %5809 = vmatprep.subr.mxu1 %v6019_v36  ;;  %5807 = vmatmul.mubr.f32.vlgmr.msra.gmra.mxu0 %v6673_v32 }
 0x7f5   : > { %5816 = vmatprep.mubr.msk.f32.mxu0 %vm6020_vm2, %v6019_v36 }
 0x7f6   : > { %v4837_v15 = vsel %vm301_vm7, %v4258_v14, 0  ;;  %5802 = vmatmul.mubr.f32.vlgmr.msra.gmra.mxu1 %v4455_v7 }
 0x7f7   : > { %v4870_v51 = vand.u32 4294901760, %v4837_v15  ;;  %5810 = vmatpush3.msra.mxu1 %v4418_v58  ;;  %5811 = vmatprep.mubr.msk.f32.mxu1 %vm6020_vm2, %v6019_v36 }
 0x7f8   : > { %5819 = vmatprep.subr.mxu1 %v6019_v36 }
 0x7f9   : > { %v4947_v16 = vsub.f32 %v4837_v15, %v4870_v51  ;;  %5815 = vmatpush3.msra.mxu0 %v4870_v51 }
 0x7fa   : > { %5817 = vmatmul.mubr.f32.vlgmr.msra.gmra.mxu0 %v4909_v8  ;;  %5824 = vmatprep.subr.mxu0 %v6019_v36 }
 0x7fb   : > { %5825 = vmatpush3.msra.mxu0 %v4947_v16  ;;  %5826 = vmatprep.mubr.msk.f32.mxu0 %vm6020_vm2, %v6019_v36  ;;  %v4948_v17 = vand.u32 4294901760, %v4947_v16 }
 0x7fc   : > { %5834 = vmatprep.subr.mxu0 %v6019_v36  ;;  %5812 = vmatmul.mubr.f32.vlgmr.msra.gmra.mxu1 %v6673_v32 }
 0x7fd   : > { %v4949_v20 = vsub.f32 %v4947_v16, %v4948_v17  ;;  %5821 = vmatprep.mubr.msk.f32.mxu1 %vm6020_vm2, %v6019_v36 }
 0x7fe   : > { %5827 = vmatmul.mubr.f32.vlgmr.msra.gmra.mxu0 %v4906_v2 }
 0x7ff   : > { %5835 = vmatpush3.msra.mxu0 %v4948_v17  ;;  %v4950_v49 = vand.u32 4294901760, %v4949_v20  ;;  %5836 = vmatprep.mubr.msk.f32.mxu0 %vm6020_vm2, %v6019_v36 }
 0x801   : > { %5820 = vmatpush3.msra.mxu1 %v4950_v49 }
 0x802   : > { %5822 = vmatmul.mubr.f32.vlgmr.msra.gmra.mxu1 %v6692_v46  ;;  %5829 = vmatprep.subr.mxu1 %v6019_v36 }
 0x803   : > { %5830 = vmatpush3.msra.mxu1 %v4870_v51  ;;  %5831 = vmatprep.mubr.msk.f32.mxu1 %vm6020_vm2, %v6019_v36 }
 0x804   : > { %5839 = vmatprep.subr.mxu1 %v6019_v36  ;;  %5837 = vmatmul.mubr.f32.vlgmr.msra.gmra.mxu0 %v6692_v46 }
 0x806   : > { %5832 = vmatmul.mubr.f32.vlgmr.msra.gmra.mxu1 %v4907_v38 }
 0x807   : > { %5840 = vmatpush3.msra.mxu1 %v4870_v51  ;;  %5841 = vmatprep.mubr.msk.f32.mxu1 %vm6020_vm2, %v6019_v36 }
 0x80a   : > { %5842 = vmatmul.mubr.f32.vlgmr.msra.gmra.mxu1 %v6692_v46 }
 0x8aa   : > { %v4459_v25 = vpop.f32.mrf.mxu0 }
 0x8ac   : > { %v5788_v9 = vpop.f32.mrf.mxu0 }
 0x8ae   : > { %v4609_v26 = vpop.f32.mrf.mxu0 }
 0x8b0   : > { %v5798_v1 = vpop.f32.mrf.mxu0 }
 0x8b2   : > { %v4535_v55 = vpop.f32.mrf.mxu1 }
 0x8b3   : > { %v4536_v32 = vadd.f32 %v4535_v55, %v4459_v25 }
 0x8b4   : > { %v5793_v31 = vpop.f32.mrf.mxu1  ;;  %v4757_v33 = vpop.f32.mrf.mxu0 }
 0x8b5   : > { %v4610_v47 = vadd.f32 %v4609_v26, %v4536_v32 }
 0x8b6   : > { %v4683_v28 = vpop.f32.mrf.mxu1  ;;  %v5808_v6 = vpop.f32.mrf.mxu0 }
 0x8b7   : > { %v4684_v18 = vadd.f32 %v4683_v28, %v4610_v47 }
 0x8b8   : > { %v5803_v34 = vpop.f32.mrf.mxu1 }
 0x8b9   : > { %v4758_v23 = vadd.f32 %v4757_v33, %v4684_v18 }
 0x8ba   : > { %v4911_v21 = vpop.f32.mrf.mxu0 }
 0x8bc   : > { %v4829_v35 = vpop.f32.mrf.mxu1  ;;  %v5818_v11 = vpop.f32.mrf.mxu0 }
 0x8bd   : > { %v4830_v36 = vadd.f32 %v4829_v35, %v4758_v23 }
 0x8be   : > { %v5813_v27 = vpop.f32.mrf.mxu1  ;;  %v5061_v39 = vpop.f32.mrf.mxu0 }
 0x8bf   : > { %v4912_v29 = vadd.f32 %v4911_v21, %v4830_v36 }
 0x8c0   : > { %v5828_v40 = vpop.f32.mrf.mxu0 }
 0x8c2   : > { %v4987_v41 = vpop.f32.mrf.mxu1 }
 0x8c3   : > { %v4988_v45 = vadd.f32 %v4987_v41, %v4912_v29 }
 0x8c4   : > { %v5823_v43 = vpop.f32.mrf.mxu1  ;;  %v5209_v48 = vpop.f32.mrf.mxu0 }
 0x8c5   : > { %v5062_v7 = vadd.f32 %v5061_v39, %v4988_v45 }
 0x8c6   : > { %v5135_v30 = vpop.f32.mrf.mxu1  ;;  %v5838_v52 = vpop.f32.mrf.mxu0 }
 0x8c7   : > { %v5136_v53 = vadd.f32 %v5135_v30, %v5062_v7 }
 0x8c8   : > { %v5833_v42 = vpop.f32.mrf.mxu1 }
 0x8c9   : > { %v5210_v19 = vadd.f32 %v5209_v48, %v5136_v53 }
 0x8ca   : > { %v5281_v22 = vpop.f32.mrf.mxu1 }
 0x8cb   : > { %v5282_v24 = vadd.f32 %v5281_v22, %v5210_v19 }
 0x8cc   : > { %v5843_v56 = vpop.f32.mrf.mxu1 }
 0x8cd   : > { %v5294_v57 = vmul.f32 %v5292_v54, %v5282_v24 }
 0x8cf   : > { %v5300_v4 = vadd.f32 %v5298_v13, %v5294_v57 }
 0x8d1   : > { %v5301_v37 = vadd.f32 3.0, %v5300_v4 }
 0x8d3   : > { %v5302_v46 = vmax.f32 %v5301_v37, 0.0 }
 0x8d5   : > { %v5303_v58 = vmin.f32 %v5302_v46, 6.0 }
 0x8d7   : > { %v5304_v59 = vmul.f32 0.16666667, %v5303_v58 }
 0x8d9   : > { %v5305_v60 = vmul.f32 %v5304_v59, %v5300_v4 }
 0x8db   : > { %5307 = vst.msk [vmem:[%s136_s27] sm:$0xff] %vm5306_vm0, %v5305_v60 }
 0x8dc   : > { %5957 = shalt.err (!%p5954_p3)
}
 0x8dd   : > { %s5958_s14 = scalar_lea.hbm %s5320_s29, 128  ;;  %s5962_s21 = scalar_lea.hbm %s6768_s2, 256 }
 0x8de   : > { %p5959_p4 = scmp.ne.s32.totalorder %s5320_s29, %s5958_s14  ;;  %p5963_p9 = scmp.lt.s32.totalorder %s5320_s29, %s6768_s2 }
 0x8df   : > { %p5964_p10 = scmp.lt.s32.totalorder %s5962_s21, %s5958_s14 }
 0x8e0   : > { %p5960_p7 = pnand %p5959_p4, %p6080_p5 }
 0x8e1   : > { %p5965_p11 = por %p5964_p10, %p5963_p9 }
 0x8e2   : > { %p5961_p8 = pneg %p5960_p7 }
 0x8e4   : > { %p5966_p12 = pnand %p5965_p11, %p5961_p8 }
 0x8e6   : > { %5969 = shalt.err (!%p5966_p12)
}
 0x8e7   : > { %5844 = dma.vmem_to_hbm [thread:$0]  (%p6080_p5), %s5323_s4, 128, %s5320_s29, %s5309_s30  }
 0x8e8 PF: > { %p5850_p13 = scmp.ge.s32.totalorder %s6004_s12, 2  ;;  %s5334_s24 = sand.u32 1, %s5992_s9  }
 0x8e9   : > { %s5335_s25 = scalar_lea.sflag [#allocation3], %s5334_s24 }
 0x8ea   : > { %p5847_p0 = pnand %p5850_p13, %p6084_p6 }
 0x8ec   : > { %p5848_p1 = pneg %p5847_p0 }
 0x8ee   : > { %5987 = dma.done.wait (%p5848_p1), %s5335_s25, 128  }
 0x8ef   : > { %5989 = vsyncadd (%p5848_p1), %s5335_s25, 4294967168  ;;  %p12_p2 = scmp.ge.s32.totalorder %s6067_s15, 4   ;;  %s6783_s9 = smov %s5996_s10 }
 0x8f0   : > { %s6784_s10 = smov %s6000_s11  ;;  %s6785_s11 = smov %s6078_s18 }
 0x8f1   : > { %s6786_s12 = smov %s6067_s15  ;;  %14 = sbr.rel (!%p12_p2) target bundleno = 3 (0x3), region = 94 }
 0x8f6   :  { %5340 = vsyncpa [#allocation3], 1 }
 0x8f7   :  { %5342 = vsyncpa [#allocation3 + $0x1], 1 }

</bundles_post_ra>
